<compile_context>
chip_gen: v7x
topology: tpu7x:2x2x1
jax: 0.10.0
libtpu: 0.0.40
codegen_flags: <defaults>
</compile_context>

<pallas_src>
import functools

import jax
import jax.numpy as jnp
from jax.experimental import pallas as pl
from jax.experimental.pallas import tpu as pltpu


def _mhsa_kernel(n_heads, d_heads,
                 x_ref, wqkv_ref, bqkv_ref, wobig_ref, bobig_ref, rz_ref,
                 out_ref):
    f32 = jnp.float32
    bf16 = jnp.bfloat16
    C = n_heads * d_heads

    xt = x_ref[...]                                   # (C, S) f32 slab (residual)
    S = xt.shape[-1]

    # Fused q/k/v in-projection: one MXU pass, bf16 operands, f32 accumulate.
    # 1/sqrt(d_heads) is pre-folded into the q rows of wqkv / bqkv on the host.
    qkv = jnp.dot(wqkv_ref[...], xt.astype(bf16),
                  preferred_element_type=f32) + bqkv_ref[...]      # (3C, S) f32

    q = qkv[0 * C:1 * C].reshape(n_heads, d_heads, S)              # (nh, d, S)
    k = qkv[1 * C:2 * C].reshape(n_heads, d_heads, S)
    v = qkv[2 * C:3 * C].reshape(n_heads, d_heads, S)

    # SDPA over the head axis; the S lane columns are a pure batch axis.
    # scores[n, m, s] = sum_d q[n, d, s] * k[m, d, s]   (stacked, no slivers)
    scores = jnp.sum(q[:, None, :, :] * k[None, :, :, :], axis=2)  # (nh, nh, S)

    m_max = jnp.max(scores, axis=1, keepdims=True)                 # (nh, 1, S)
    p = jnp.exp(scores - m_max)                                    # (nh, nh, S)
    denom = jnp.sum(p, axis=1, keepdims=True)                      # (nh, 1, S)
    p = p * pl.reciprocal(denom, approx=True)                      # EUP rcp

    # o[n, d, s] = sum_m p[n, m, s] * v[m, d, s]
    o = jnp.sum(p[:, :, None, :] * v[None, :, :, :], axis=1)       # (nh, d, S)

    # torch: x.permute(0,2,3,1).contiguous().view(B, HW, C) -- with HW == C this
    # raw reinterpretation is exactly "heads stacked along the row axis".
    o_cat = o.reshape(C, S)                                        # (C, S)

    # Out-projection: the module's raw .view() makes it contract over the
    # *within-batch spatial* axis; with batches packed into the lanes this is a
    # single block-diagonal (S, S) matmul (prepared host-side, bf16 operands).
    out = jnp.dot(o_cat.astype(bf16), wobig_ref[...],
                  preferred_element_type=f32) + bobig_ref[...]     # (C, S) f32

    # residual + ReZero * output, one lane-dense (C, S) store.
    out_ref[...] = xt + rz_ref[0, 0] * out


def mhsa_forward(x, params, *, n_heads, batch_per_block=None):
    B, C, H, W = x.shape
    HW = H * W
    DH = C // n_heads
    if HW != C:
        # The torch forward's raw .view() reinterpretations only reduce to this
        # kernel's formulation when H*W == C; other shapes silently change the
        # module's own semantics, so refuse instead of guessing.
        raise NotImplementedError("kernel requires H*W == channels (module's raw .view()s)")

    w_in, b_in, w_out, b_out, rz = params  # torch layouts: (3C,C),(3C,),(C,C),(C,),(1,)

    # ---- host-side (tiny, traced once) parameter prep ----------------------
    scale = 1.0 / (float(DH) ** 0.5)
    w_r = w_in.reshape(n_heads, 3, DH, C)           # interleaved layout from
    b_r = b_in.reshape(n_heads, 3, DH)              # view(B,HW,nh,3d).chunk(3,-1)
    wq = w_r[:, 0].reshape(C, C) * scale            # fold softmax scale into q
    wk = w_r[:, 1].reshape(C, C)
    wv = w_r[:, 2].reshape(C, C)
    w_qkv = jnp.concatenate([wq, wk, wv], axis=0).astype(jnp.bfloat16)   # (3C, C)
    b_qkv = jnp.concatenate([b_r[:, 0].reshape(C) * scale,
                             b_r[:, 1].reshape(C),
                             b_r[:, 2].reshape(C)], axis=0).reshape(3 * C, 1)

    # Pack the batch into the lane axis: x_slab[c, b*HW + s] = x[b, c, s].
    if batch_per_block is None:
        batch_per_block = max(1, min(B, 128 // HW))   # >=128 lanes per block
    assert B % batch_per_block == 0
    S_BLK = batch_per_block * HW
    n_blk = B // batch_per_block
    x_slab = jnp.transpose(x.reshape(B, C, HW), (1, 0, 2)).reshape(C, B * HW)

    # Block-diagonal out-projection weight (one W_out^T block per batch packed
    # into the lane block) + matching tiled bias.  Keeps the residual x in f32.
    wo_big = jnp.kron(jnp.eye(batch_per_block, dtype=w_out.dtype),
                      w_out.T).astype(jnp.bfloat16)                 # (S_BLK, S_BLK)
    bo_big = jnp.tile(b_out, batch_per_block).reshape(1, S_BLK)     # f32
    rz2 = rz.reshape(1, 1)

    kernel = functools.partial(_mhsa_kernel, n_heads, DH)

    out = pl.pallas_call(
        kernel,
        out_shape=jax.ShapeDtypeStruct((C, B * HW), jnp.float32),
        grid_spec=pltpu.PrefetchScalarGridSpec(
            num_scalar_prefetch=0,
            grid=(n_blk,),
            in_specs=[
                pl.BlockSpec((C, S_BLK), lambda i: (0, i)),        # x slab (f32)
                pl.BlockSpec((3 * C, C), lambda i: (0, 0)),        # fused Wqkv (bf16)
                pl.BlockSpec((3 * C, 1), lambda i: (0, 0)),        # fused bias (f32)
                pl.BlockSpec((S_BLK, S_BLK), lambda i: (0, 0)),    # block-diag Wout^T (bf16)
                pl.BlockSpec((1, S_BLK), lambda i: (0, 0)),        # tiled out bias (f32)
                pl.BlockSpec(memory_space=pltpu.MemorySpace.SMEM), # ReZero scalar
            ],
            out_specs=pl.BlockSpec((C, S_BLK), lambda i: (0, i)),
        ),
        compiler_params=pltpu.CompilerParams(
            # n_blk grows with B; "parallel" lets v7x shard the lane blocks
            # across its two TensorCores (n_blk == 1 at this demo size).
            dimension_semantics=("parallel",)),
    )(x_slab, w_qkv, b_qkv, wo_big, bo_big, rz2)

    return jnp.transpose(out.reshape(C, B, HW), (1, 0, 2)).reshape(B, C, H, W)


def reference_forward(x, params, n_heads):
    """Pure-JAX f32 mirror of the torch forward (for validation)."""
    B, C, H, W = x.shape
    HW = H * W
    d = C // n_heads
    w_in, b_in, w_out, b_out, rz = params
    xs = jnp.transpose(x, (0, 2, 3, 1)).reshape(B, HW, C)
    qkv = xs @ w_in.T + b_in
    qkv = qkv.reshape(B, HW, n_heads, 3 * d)
    q, k, v = qkv[..., :d], qkv[..., d:2 * d], qkv[..., 2 * d:]
    scale = 1.0 / jnp.sqrt(jnp.float32(d))
    s = jnp.einsum('bsnd,bsmd->bsnm', q, k) * scale
    p = jax.nn.softmax(s, axis=-1)
    o = jnp.einsum('bsnm,bsmd->bsnd', p, v)
    o = jnp.transpose(o, (0, 2, 3, 1)).reshape(B, HW, C)     # raw .view() mirror
    out = o @ w_out.T + b_out
    out = out.reshape(B, C, H, W)                            # raw .view() mirror
    return x + rz * out


if __name__ == "__main__":
    B, C, H, W = 2, 64, 8, 8      # C multiple of 32 (GroupNorm ctor); H*W == C
    n_heads = 8

    keys = jax.random.split(jax.random.PRNGKey(0), 5)
    x = jax.random.normal(keys[0], (B, C, H, W), jnp.float32)

    bound = 1.0 / (float(C) ** 0.5)   # torch nn.Linear default init bounds
    w_in = jax.random.uniform(keys[1], (3 * C, C), jnp.float32, -bound, bound)
    b_in = jax.random.uniform(keys[2], (3 * C,), jnp.float32, -bound, bound)
    w_out = jax.random.uniform(keys[3], (C, C), jnp.float32, -bound, bound)
    b_out = jax.random.uniform(keys[4], (C,), jnp.float32, -bound, bound)
    rz = jnp.full((1,), 0.5, jnp.float32)  # torch init is zeros; nonzero to exercise path
    params = (w_in, b_in, w_out, b_out, rz)

    fwd = jax.jit(functools.partial(mhsa_forward, n_heads=n_heads))
    out = jax.block_until_ready(fwd(x, params))
    ref = reference_forward(x, params, n_heads)

    assert out.shape == (B, C, H, W)
    max_err = float(jnp.max(jnp.abs(out - ref)))
    mean_err = float(jnp.mean(jnp.abs(out - ref)))
    # bf16 MXU operands (f32 accumulation) + approx reciprocal vs. an f32
    # reference -> slightly looser tolerance than a pure-f32 path.
    assert max_err < 5e-2 and mean_err < 5e-3, (max_err, mean_err)
    print("KERNEL_OK")
</pallas_src>

<mosaic_0001>
module attributes {stable_mosaic.version = 11 : i64} {
  func.func @_mhsa_kernel(%arg0: i32, %arg1: memref<64x128xf32, #tpu.memory_space<vmem>>, %arg2: memref<192x64xbf16, #tpu.memory_space<vmem>>, %arg3: memref<192x1xf32, #tpu.memory_space<vmem>>, %arg4: memref<128x128xbf16, #tpu.memory_space<vmem>>, %arg5: memref<1x128xf32, #tpu.memory_space<vmem>>, %arg6: memref<1x1xf32, #tpu.memory_space<smem>>, %arg7: memref<64x128xf32, #tpu.memory_space<vmem>>) attributes {dimension_semantics = [#tpu.dimension_semantics<parallel>], iteration_bounds = array<i64: 1>, scalar_prefetch = 0 : i64, scratch_operands = 0 : i64, tpu.core_type = #tpu.core_type<tc>, window_params = [{transform_indices = @transform_0, window_bounds = array<i64: 64, 128>}, {pipeline_mode = #tpu.pipeline_mode<synchronous>, transform_indices = @transform_1, window_bounds = array<i64: 192, 64>}, {pipeline_mode = #tpu.pipeline_mode<synchronous>, transform_indices = @transform_2, window_bounds = array<i64: 192, 1>}, {pipeline_mode = #tpu.pipeline_mode<synchronous>, transform_indices = @transform_3, window_bounds = array<i64: 128, 128>}, {pipeline_mode = #tpu.pipeline_mode<synchronous>, transform_indices = @transform_4, window_bounds = array<i64: 1, 128>}, {transform_indices = @transform_5, window_bounds = array<i64: 1, 1>}, {transform_indices = @transform_6, window_bounds = array<i64: 64, 128>}]} {
    %c0 = arith.constant 0 : index
    %c0_0 = arith.constant 0 : index
    %0 = vector.load %arg1[%c0, %c0_0] : memref<64x128xf32, #tpu.memory_space<vmem>>, vector<64x128xf32>
    %c0_1 = arith.constant 0 : index
    %c0_2 = arith.constant 0 : index
    %1 = vector.load %arg2[%c0_1, %c0_2] : memref<192x64xbf16, #tpu.memory_space<vmem>>, vector<192x64xbf16>
    %2 = arith.truncf %0 : vector<64x128xf32> to vector<64x128xbf16>
    %cst = arith.constant dense<0.000000e+00> : vector<192x128xf32>
    %3 = tpu.matmul %1, %2, %cst {dimension_numbers = #tpu.dot_dimension_numbers<[1], [0], [0], [1], [0, 0, 1, 1], [], []>} : vector<192x64xbf16>, vector<64x128xbf16>, vector<192x128xf32> -> vector<192x128xf32>
    %c0_3 = arith.constant 0 : index
    %c0_4 = arith.constant 0 : index
    %4 = vector.load %arg3[%c0_3, %c0_4] : memref<192x1xf32, #tpu.memory_space<vmem>>, vector<192x1xf32>
    %5 = vector.broadcast %4 : vector<192x1xf32> to vector<192x128xf32>
    %6 = arith.addf %3, %5 : vector<192x128xf32>
    %7 = vector.extract_strided_slice %6 {offsets = [0, 0], sizes = [64, 128], strides = [1, 1]} : vector<192x128xf32> to vector<64x128xf32>
    %8 = vector.shape_cast %7 : vector<64x128xf32> to vector<8x8x128xf32>
    %9 = vector.extract_strided_slice %6 {offsets = [64, 0], sizes = [64, 128], strides = [1, 1]} : vector<192x128xf32> to vector<64x128xf32>
    %10 = vector.shape_cast %9 : vector<64x128xf32> to vector<8x8x128xf32>
    %11 = vector.extract_strided_slice %6 {offsets = [128, 0], sizes = [64, 128], strides = [1, 1]} : vector<192x128xf32> to vector<64x128xf32>
    %12 = vector.shape_cast %11 : vector<64x128xf32> to vector<8x8x128xf32>
    %13 = vector.shape_cast %8 : vector<8x8x128xf32> to vector<8x1x8x128xf32>
    %14 = vector.shape_cast %10 : vector<8x8x128xf32> to vector<1x8x8x128xf32>
    %15 = vector.broadcast %13 : vector<8x1x8x128xf32> to vector<8x8x8x128xf32>
    %16 = vector.broadcast %14 : vector<1x8x8x128xf32> to vector<8x8x8x128xf32>
    %17 = arith.mulf %15, %16 : vector<8x8x8x128xf32>
    %cst_5 = arith.constant dense<0.000000e+00> : vector<8x8x128xf32>
    %18 = vector.multi_reduction <add>, %17, %cst_5 [2] : vector<8x8x8x128xf32> to vector<8x8x128xf32>
    %cst_6 = arith.constant dense<0xFF800000> : vector<8x128xf32>
    %19 = vector.multi_reduction <maximumf>, %18, %cst_6 [1] : vector<8x8x128xf32> to vector<8x128xf32>
    %20 = vector.shape_cast %19 : vector<8x128xf32> to vector<8x1x128xf32>
    %21 = vector.broadcast %20 : vector<8x1x128xf32> to vector<8x8x128xf32>
    %22 = arith.subf %18, %21 : vector<8x8x128xf32>
    %23 = math.exp %22 : vector<8x8x128xf32>
    %cst_7 = arith.constant dense<0.000000e+00> : vector<8x128xf32>
    %24 = vector.multi_reduction <add>, %23, %cst_7 [1] : vector<8x8x128xf32> to vector<8x128xf32>
    %25 = vector.shape_cast %24 : vector<8x128xf32> to vector<8x1x128xf32>
    %26 = tpu.reciprocal %25 {approx = true} : vector<8x1x128xf32> -> vector<8x1x128xf32>
    %27 = vector.broadcast %26 : vector<8x1x128xf32> to vector<8x8x128xf32>
    %28 = arith.mulf %23, %27 : vector<8x8x128xf32>
    %29 = vector.shape_cast %28 : vector<8x8x128xf32> to vector<8x8x1x128xf32>
    %30 = vector.shape_cast %12 : vector<8x8x128xf32> to vector<1x8x8x128xf32>
    %31 = vector.broadcast %29 : vector<8x8x1x128xf32> to vector<8x8x8x128xf32>
    %32 = vector.broadcast %30 : vector<1x8x8x128xf32> to vector<8x8x8x128xf32>
    %33 = arith.mulf %31, %32 : vector<8x8x8x128xf32>
    %cst_8 = arith.constant dense<0.000000e+00> : vector<8x8x128xf32>
    %34 = vector.multi_reduction <add>, %33, %cst_8 [1] : vector<8x8x8x128xf32> to vector<8x8x128xf32>
    %35 = vector.shape_cast %34 : vector<8x8x128xf32> to vector<64x128xf32>
    %36 = arith.truncf %35 : vector<64x128xf32> to vector<64x128xbf16>
    %c0_9 = arith.constant 0 : index
    %c0_10 = arith.constant 0 : index
    %37 = vector.load %arg4[%c0_9, %c0_10] : memref<128x128xbf16, #tpu.memory_space<vmem>>, vector<128x128xbf16>
    %cst_11 = arith.constant dense<0.000000e+00> : vector<64x128xf32>
    %38 = tpu.matmul %36, %37, %cst_11 {dimension_numbers = #tpu.dot_dimension_numbers<[1], [0], [0], [1], [0, 0, 1, 1], [], []>} : vector<64x128xbf16>, vector<128x128xbf16>, vector<64x128xf32> -> vector<64x128xf32>
    %c0_12 = arith.constant 0 : index
    %c0_13 = arith.constant 0 : index
    %39 = vector.load %arg5[%c0_12, %c0_13] : memref<1x128xf32, #tpu.memory_space<vmem>>, vector<1x128xf32>
    %40 = vector.broadcast %39 : vector<1x128xf32> to vector<64x128xf32>
    %41 = arith.addf %38, %40 : vector<64x128xf32>
    %c0_14 = arith.constant 0 : index
    %c0_15 = arith.constant 0 : index
    %42 = memref.load %arg6[%c0_14, %c0_15] : memref<1x1xf32, #tpu.memory_space<smem>>
    %43 = vector.broadcast %42 : f32 to vector<64x128xf32>
    %44 = arith.mulf %43, %41 : vector<64x128xf32>
    %45 = arith.addf %0, %44 : vector<64x128xf32>
    %c0_16 = arith.constant 0 : index
    %c0_17 = arith.constant 0 : index
    %46 = vector.load %arg7[%c0_16, %c0_17] : memref<64x128xf32, #tpu.memory_space<vmem>>, vector<64x128xf32>
    tpu.vector_store %arg7[%c0_16, %c0_17], %45 {strides = array<i32>} : memref<64x128xf32, #tpu.memory_space<vmem>>, vector<64x128xf32>,
    return
  }
  func.func @transform_0(%arg0: i32) -> (i32, i32) {
    %c0_i32 = arith.constant 0 : i32
    %c0_i32_0 = arith.constant 0 : i32
    return %c0_i32, %arg0 : i32, i32
  }
  func.func @transform_1(%arg0: i32) -> (i32, i32) {
    %c0_i32 = arith.constant 0 : i32
    %c0_i32_0 = arith.constant 0 : i32
    %c0_i32_1 = arith.constant 0 : i32
    return %c0_i32, %c0_i32_0 : i32, i32
  }
  func.func @transform_2(%arg0: i32) -> (i32, i32) {
    %c0_i32 = arith.constant 0 : i32
    %c0_i32_0 = arith.constant 0 : i32
    %c0_i32_1 = arith.constant 0 : i32
    return %c0_i32, %c0_i32_0 : i32, i32
  }
  func.func @transform_3(%arg0: i32) -> (i32, i32) {
    %c0_i32 = arith.constant 0 : i32
    %c0_i32_0 = arith.constant 0 : i32
    %c0_i32_1 = arith.constant 0 : i32
    return %c0_i32, %c0_i32_0 : i32, i32
  }
  func.func @transform_4(%arg0: i32) -> (i32, i32) {
    %c0_i32 = arith.constant 0 : i32
    %c0_i32_0 = arith.constant 0 : i32
    %c0_i32_1 = arith.constant 0 : i32
    return %c0_i32, %c0_i32_0 : i32, i32
  }
  func.func @transform_5(%arg0: i32) -> (i32, i32) {
    %c0_i32 = arith.constant 0 : i32
    %c0_i32_0 = arith.constant 0 : i32
    %c0_i32_1 = arith.constant 0 : i32
    return %c0_i32, %c0_i32_0 : i32, i32
  }
  func.func @transform_6(%arg0: i32) -> (i32, i32) {
    %c0_i32 = arith.constant 0 : i32
    %c0_i32_0 = arith.constant 0 : i32
    return %c0_i32, %arg0 : i32, i32
  }
}

</mosaic_0001>

<bundles_post_ra>
// kernel: tile.8
= control target key start
LH: loop header
LB: loop body
LE: loop exit
PB: predicated region body
PF: predicated region fallthrough
CT: control target
= control target key end

     0   :  { %s22_s0 = inlined_call_operand.vmem [shape: f32[64], index: 0, kind: input, shape index: {}]   ;;  %s23_s1 = inlined_call_operand.vmem [shape: f32[2,64], index: 1, kind: output, shape index: {}]  }
   0x1   :  { %v4_v0 = vld [vmem:[%s22_s0] ss:$0 sm:$0xff] }
   0x2   :  { %5 = vst [vmem:[%s23_s1] sm:$0x3] %v4_v0 }

// kernel: tile.9
= control target key start
LH: loop header
LB: loop body
LE: loop exit
PB: predicated region body
PF: predicated region fallthrough
CT: control target
= control target key end

     0   :  { %vm7_vm0 = vcmask 523264   ;;  %vm13_vm1 = vcmask 1048064   ;;  %s39_s0 = inlined_call_operand.vmem [shape: f32[2,64], index: 0, kind: input, shape index: {}]   ;;  %s40_s1 = inlined_call_operand.vmem [shape: f32[1,128], index: 1, kind: output, shape index: {}]  }
   0x1   :  { %v4_v0 = vld [vmem:[%s39_s0] sm:$0x3]  ;;  %s22_s0 = smov 64  }
   0x2   :  { %5 = vst [vmem:[#allocation1] sm:$0x3] %v4_v0 }
   0x9   :  { %v10_v1 = vld [vmem:[#allocation1 + $0x1] sm:$0x1]   ;;  %v6_v2 = vld [vmem:[#allocation1] sm:$0x1]  }
   0xa   :  { %11 = vrot.lane.b32.xlu0 %v10_v1, %s22_s0  ;;  %8 = vst.msk [vmem:[#allocation0] sm:$0x1] %vm7_vm0, %v6_v2  }
  0x7c   :  { %v12_v3 = vpop.permute.xlu0 %11  }
  0x7d   :  { %14 = vst.msk [vmem:[#allocation0] sm:$0x1] %vm13_vm1, %v12_v3  }
  0x84   :  { %v18_v4 = vld [vmem:[#allocation0] sm:$0x1] }
  0x85   :  { %20 = vst [vmem:[%s40_s1] sm:$0x1] %v18_v4 }

// kernel: mhsa_forward.1
= control target key start
LH: loop header
LB: loop body
LE: loop exit
PB: predicated region body
PF: predicated region fallthrough
CT: control target
= control target key end

     0   :  { %v2308_v3 = vmov 0   ;;  %vm265_vm0 = vcmask 523264   ;;  %vm1192_vm1 = vcmask 1041409   ;;  %vm1195_vm2 = vcmask 1042434   ;;  %s3826_s0 = inlined_call_operand.vmem [shape: f32[64,128], index: 0, kind: input, shape index: {}]   ;;  %s3827_s1 = inlined_call_operand.vmem [shape: bf16[192,64], index: 1, kind: input, shape index: {}]   ;;  %s3828_s2 = inlined_call_operand.vmem [shape: f32[192,1], index: 2, kind: input, shape index: {}]   ;;  %s3829_s3 = inlined_call_operand.vmem [shape: bf16[128,128], index: 3, kind: input, shape index: {}]   ;;  %s3830_s4 = inlined_call_operand.vmem [shape: f32[1,128], index: 4, kind: input, shape index: {}]   ;;  %s3831_s5 = inlined_call_operand.<no memory space> [shape: f32[1,1], index: 5, kind: input, shape index: {}]   ;;  %s3832_s6 = inlined_call_operand.vmem [shape: f32[64,128], index: 6, kind: output, shape index: {}]  }
   0x1   :  { %v25_v0 = vld [vmem:[%s3826_s0] sm:$0xff]  ;;  %v26_v1 = vld [vmem:[%s3826_s0 + $0x8] sm:$0xff]  ;;  %v27_v2 = vld [vmem:[%s3826_s0 + $0x10] sm:$0xff]  ;;  %2134 = vset.pattern.permute.xlu0 %v2308_v3  ;;  %2135 = vset.pattern.permute.xlu1 %v2308_v3  ;;  %vm1198_vm3 = vcmask 1043459   ;;  %vm1201_vm4 = vcmask 1044484   ;;  %vm1204_vm5 = vcmask 1045509  }
   0x2   :  { %v57_v4 = vpack.c.bf16 %v26_v1, %v25_v0  ;;  %v28_v5 = vld [vmem:[%s3826_s0 + $0x18] sm:$0xff]  ;;  %v29_v7 = vld [vmem:[%s3826_s0 + $0x20] sm:$0xff]  ;;  %v30_v8 = vld [vmem:[%s3826_s0 + $0x28] sm:$0xff]  ;;  %vm1207_vm6 = vcmask 1046534   ;;  %vm1210_vm7 = vcmask 1047559  }
   0x3   :  { %v58_v6 = vpack.c.bf16 %v28_v5, %v27_v2  ;;  %v2136_v9 = vld [vmem:[%s3827_s1] sm:$0xff]   ;;  %v59_v10 = vpack.c.bf16 %v30_v8, %v29_v7  ;;  %v31_v11 = vld [vmem:[%s3826_s0 + $0x30] sm:$0xff]  ;;  %v32_v12 = vld [vmem:[%s3826_s0 + $0x38] sm:$0xff] }
   0x4   :  { %2077 = vmatprep.subr.bf16.mxu0 %v57_v4  ;;  %2085 = vmatprep.mubr.msk.bf16.mxu0 %vm265_vm0, %v2136_v9  ;;  %v60_v13 = vpack.c.bf16 %v32_v12, %v31_v11  ;;  %v61_v14 = vld [vmem:[%s3828_s2] sm:$0xff]  ;;  %v2137_v15 = vld [vmem:[%s3827_s1 + $0x8] sm:$0xff]   ;;  %v2138_v17 = vld [vmem:[%s3827_s1 + $0x10] sm:$0xff]  }
   0x5   :  { %2078 = vmatpush3.bf16.msra.mxu0 %v57_v4  ;;  %87 = vperm.xlu0 %2134, %v61_v14   ;;  %v69_v16 = vld [vmem:[%s3828_s2 + $0x40] sm:$0xff]  ;;  %v62_v18 = vld [vmem:[%s3828_s2 + $0x8] sm:$0xff]  ;;  %v63_v20 = vld [vmem:[%s3828_s2 + $0x10] sm:$0xff] }
   0x6   :  { %2079 = vmatprep.subr.bf16.mxu0 %v58_v6  ;;  %127 = vperm.xlu1 %2135, %v69_v16   ;;  %v70_v19 = vld [vmem:[%s3828_s2 + $0x48] sm:$0xff]  ;;  %v64_v21 = vld [vmem:[%s3828_s2 + $0x18] sm:$0xff]  ;;  %v2140_v23 = vld [vmem:[%s3827_s1 + $0x20] sm:$0xff]  }
   0x7   :  { %v2139_v22 = vld [vmem:[%s3827_s1 + $0x18] sm:$0xff]   ;;  %v71_v24 = vld [vmem:[%s3828_s2 + $0x50] sm:$0xff]  ;;  %v73_v26 = vld [vmem:[%s3828_s2 + $0x60] sm:$0xff] }
   0x8   :  { %v72_v25 = vld [vmem:[%s3828_s2 + $0x58] sm:$0xff]  ;;  %v65_v27 = vld [vmem:[%s3828_s2 + $0x20] sm:$0xff]  ;;  %v2141_v28 = vld [vmem:[%s3827_s1 + $0x28] sm:$0xff]  }
   0x9   :  { %2080 = vmatpush3.bf16.msra.mxu0 %v58_v6  ;;  %92 = vperm.xlu0 %2134, %v62_v18   ;;  %v2142_v29 = vld [vmem:[%s3827_s1 + $0x30] sm:$0xff]   ;;  %v66_v30 = vld [vmem:[%s3828_s2 + $0x28] sm:$0xff]  ;;  %v68_v33 = vld [vmem:[%s3828_s2 + $0x38] sm:$0xff] }
   0xa   :  { %2081 = vmatprep.subr.bf16.mxu0 %v59_v10  ;;  %132 = vperm.xlu1 %2135, %v70_v19   ;;  %v74_v31 = vld [vmem:[%s3828_s2 + $0x68] sm:$0xff]  ;;  %v67_v32 = vld [vmem:[%s3828_s2 + $0x30] sm:$0xff]  ;;  %v2143_v34 = vld [vmem:[%s3827_s1 + $0x38] sm:$0xff]  }
   0xb   :  { %v2144_v35 = vld [vmem:[%s3827_s1 + $0x40] sm:$0xff]   ;;  %v75_v36 = vld [vmem:[%s3828_s2 + $0x70] sm:$0xff]  ;;  %v76_v37 = vld [vmem:[%s3828_s2 + $0x78] sm:$0xff] }
   0xc   :  { %v77_v38 = vld [vmem:[%s3828_s2 + $0x80] sm:$0xff]  ;;  %v78_v39 = vld [vmem:[%s3828_s2 + $0x88] sm:$0xff]  ;;  %v2146_v41 = vld [vmem:[%s3827_s1 + $0x50] sm:$0xff]  }
   0xd   :  { %2082 = vmatpush3.bf16.msra.mxu0 %v59_v10  ;;  %97 = vperm.xlu0 %2134, %v63_v20   ;;  %v2145_v40 = vld [vmem:[%s3827_s1 + $0x48] sm:$0xff]   ;;  %v79_v42 = vld [vmem:[%s3828_s2 + $0x90] sm:$0xff]  ;;  %v80_v43 = vld [vmem:[%s3828_s2 + $0x98] sm:$0xff] }
   0xe   :  { %2083 = vmatprep.subr.bf16.mxu0 %v60_v13  ;;  %102 = vperm.xlu1 %2135, %v64_v21   ;;  %v81_v44 = vld [vmem:[%s3828_s2 + $0xa0] sm:$0xff]  ;;  %v82_v45 = vld [vmem:[%s3828_s2 + $0xa8] sm:$0xff]  ;;  %v2147_v46 = vld [vmem:[%s3827_s1 + $0x58] sm:$0xff]  }
   0xf   :  { %v83_v47 = vld [vmem:[%s3828_s2 + $0xb0] sm:$0xff]  ;;  %v84_v48 = vld [vmem:[%s3828_s2 + $0xb8] sm:$0xff]  ;;  %v2148_v49 = vld [vmem:[%s3829_s3] sm:$0xff]  }
  0x10   :  { %v2149_v50 = vld [vmem:[%s3829_s3 + $0x8] sm:$0xff]   ;;  %2109 = vmatprep.subr.bf16.mxu1 %v2148_v49  ;;  %v2150_v51 = vld [vmem:[%s3829_s3 + $0x10] sm:$0xff]   ;;  %v2151_v52 = vld [vmem:[%s3829_s3 + $0x18] sm:$0xff]  }
  0x11   :  { %2084 = vmatpush3.bf16.msra.mxu0 %v60_v13  ;;  %137 = vperm.xlu0 %2134, %v71_v24   ;;  %v2152_v53 = vld [vmem:[%s3829_s3 + $0x20] sm:$0xff]   ;;  %v2153_v54 = vld [vmem:[%s3829_s3 + $0x28] sm:$0xff]   ;;  %v2154_v55 = vld [vmem:[%s3829_s3 + $0x30] sm:$0xff]  }
  0x12   :  { %142 = vperm.xlu1 %2135, %v72_v25   ;;  %2110 = vmatpush3.bf16.msra.mxu1 %v2148_v49  ;;  %v2155_v56 = vld [vmem:[%s3829_s3 + $0x38] sm:$0xff]  }
  0x13   :  { %2111 = vmatprep.subr.bf16.mxu1 %v2149_v50 }
  0x14   :  { %2086 = vmatmul.mubr.msk.bf16.vlgmr.msra.gmra.mrb[0].mxu0 %vm265_vm0, %v2137_v15 }
  0x15   :  { %2089 = vmatprep.mubr.msk.bf16.mxu0 %vm265_vm0, %v2138_v17  ;;  %147 = vperm.xlu0 %2134, %v73_v26  }
  0x16   :  { %107 = vperm.xlu1 %2135, %v65_v27   ;;  %2112 = vmatpush3.bf16.msra.mxu1 %v2149_v50 }
  0x17   :  { %2113 = vmatprep.subr.bf16.mxu1 %v2150_v51 }
  0x19   :  { %112 = vperm.xlu0 %2134, %v66_v30  }
  0x1a   :  { %152 = vperm.xlu1 %2135, %v74_v31   ;;  %2114 = vmatpush3.bf16.msra.mxu1 %v2150_v51 }
  0x1b   :  { %2115 = vmatprep.subr.bf16.mxu1 %v2151_v52 }
  0x1c   :  { %2090 = vmatmul.mubr.msk.bf16.gmra.mrb[4].mxu0 %vm265_vm0, %v2139_v22 }
  0x1d   :  { %2093 = vmatprep.mubr.msk.bf16.mxu0 %vm265_vm0, %v2140_v23  ;;  %117 = vperm.xlu0 %2134, %v67_v32  }
  0x1e   :  { %122 = vperm.xlu1 %2135, %v68_v33   ;;  %2116 = vmatpush3.bf16.msra.mxu1 %v2151_v52 }
  0x1f   :  { %2117 = vmatprep.subr.bf16.mxu1 %v2152_v53 }
  0x21   :  { %157 = vperm.xlu0 %2134, %v75_v36  }
  0x22   :  { %162 = vperm.xlu1 %2135, %v76_v37   ;;  %2118 = vmatpush3.bf16.msra.mxu1 %v2152_v53 }
  0x23   :  { %2119 = vmatprep.subr.bf16.mxu1 %v2153_v54 }
  0x24   :  { %2094 = vmatmul.mubr.msk.bf16.gmra.mrb[8].mxu0 %vm265_vm0, %v2141_v28 }
  0x25   :  { %2097 = vmatprep.mubr.msk.bf16.mxu0 %vm265_vm0, %v2142_v29  ;;  %167 = vperm.xlu0 %2134, %v77_v38  }
  0x26   :  { %172 = vperm.xlu1 %2135, %v78_v39   ;;  %2120 = vmatpush3.bf16.msra.mxu1 %v2153_v54 }
  0x27   :  { %2121 = vmatprep.subr.bf16.mxu1 %v2154_v55 }
  0x29   :  { %177 = vperm.xlu0 %2134, %v79_v42  }
  0x2a   :  { %182 = vperm.xlu1 %2135, %v80_v43   ;;  %2122 = vmatpush3.bf16.msra.mxu1 %v2154_v55 }
  0x2b   :  { %2123 = vmatprep.subr.bf16.mxu1 %v2155_v56 }
  0x2c   :  { %2098 = vmatmul.mubr.msk.bf16.gmra.mrb[12].mxu0 %vm265_vm0, %v2143_v34 }
  0x2d   :  { %2101 = vmatprep.mubr.msk.bf16.mxu0 %vm265_vm0, %v2144_v35  ;;  %187 = vperm.xlu0 %2134, %v81_v44  }
  0x2e   :  { %192 = vperm.xlu1 %2135, %v82_v45   ;;  %2124 = vmatpush3.bf16.msra.mxu1 %v2155_v56 }
  0x31   :  { %197 = vperm.xlu0 %2134, %v83_v47  }
  0x32   :  { %202 = vperm.xlu1 %2135, %v84_v48  }
  0x34   :  { %2102 = vmatmul.mubr.msk.bf16.gmra.mrb[16].mxu0 %vm265_vm0, %v2145_v40 }
  0x35   :  { %2105 = vmatprep.mubr.msk.bf16.mxu0 %vm265_vm0, %v2146_v41 }
  0x3c   :  { %2106 = vmatmul.mubr.msk.bf16.gmra.mrb[20].mxu0 %vm265_vm0, %v2147_v46 }
  0x84   :  { %v88_v57 = vpop.permute.xlu0 %87 }
  0x85   :  { %v128_v58 = vpop.permute.xlu1 %127 }
  0x88   :  { %v93_v59 = vpop.permute.xlu0 %92 }
  0x89   :  { %v2512_v60 = vpop.permute.xlu1 %132 }
  0x8c   :  { %v98_v61 = vpop.permute.xlu0 %97 }
  0x8d   :  { %v103_v62 = vpop.permute.xlu1 %102 }
  0x90   :  { %v138_v63 = vpop.permute.xlu0 %137 }
  0x91   :  { %v2514_v0 = vpop.permute.xlu1 %142 }
  0x94   :  { %v2516_v5 = vpop.permute.xlu0 %147 }
  0x95   :  { %v108_v6 = vpop.permute.xlu1 %107 }
  0x98   :  { %v113_v9 = vpop.permute.xlu0 %112 }
  0x99   :  { %v2518_v11 = vpop.permute.xlu1 %152 }
  0x9c   :  { %v118_v13 = vpop.permute.xlu0 %117 }
  0x9d   :  { %v123_v17 = vpop.permute.xlu1 %122 }
  0xe7   :  { %v2087_v1 = vpop.f32.mrb[0].mxu0 }
  0xe8   :  { %v336_v2 = vpop.f32.mrb[1].mxu0  ;;  %v2520_v14 = vadd.f32 %v2087_v1, %v98_v61 }
  0xe9   :  { %v2088_v3 = vpop.f32.mrb[2].mxu0  ;;  %v2522_v15 = vadd.f32 %v336_v2, %v88_v57 }
  0xea   :  { %v339_v4 = vpop.f32.mrb[3].mxu0  ;;  %v2524_v18 = vadd.f32 %v2088_v3, %v103_v62 }
  0xeb   :  { %v2526_v19 = vadd.f32 %v339_v4, %v93_v59 }
  0xef   :  { %v2091_v7 = vpop.f32.mrb[4].mxu0 }
  0xf0   :  { %v352_v8 = vpop.f32.mrb[5].mxu0  ;;  %v2528_v20 = vadd.f32 %v2091_v7, %v118_v13 }
  0xf1   :  { %v2092_v10 = vpop.f32.mrb[6].mxu0  ;;  %v2530_v23 = vadd.f32 %v352_v8, %v108_v6 }
  0xf2   :  { %v355_v12 = vpop.f32.mrb[7].mxu0  ;;  %3890 = vst [vmem:[#allocation3_spill] sm:$0xff] %v2528_v20  ;;  %v2532_v24 = vadd.f32 %v2092_v10, %v123_v17 }
  0xf3   :  { %v2534_v25 = vadd.f32 %v355_v12, %v113_v9 }
  0xf4   :  { %3891 = vst [vmem:[#allocation4_spill] sm:$0xff] %v2532_v24 }
  0xf7   :  { %v2095_v16 = vpop.f32.mrb[8].mxu0 }
  0xf8   :  { %v377_v21 = vadd.f32 %v2095_v16, %v138_v63  ;;  %v368_v22 = vpop.f32.mrb[9].mxu0 }
  0xf9   :  { %v369_v26 = vadd.f32 %v368_v22, %v128_v58  ;;  %v2536_v27 = vpop.f32.mrb[10].mxu0 }
  0xfa   :  { %v433_v28 = vmul.f32 %v377_v21, %v2522_v15  ;;  %v441_v29 = vmul.f32 %v377_v21, %v2526_v19  ;;  %v449_v30 = vmul.f32 %v377_v21, %v2520_v14  ;;  %v457_v31 = vmul.f32 %v377_v21, %v2524_v18  ;;  %v2542_v32 = vpop.f32.mrb[11].mxu0 }
  0xfb   :  { %v465_v33 = vmul.f32 %v377_v21, %v2530_v23  ;;  %v473_v34 = vmul.f32 %v377_v21, %v2534_v25  ;;  %v481_v35 = vmul.f32 %v377_v21, %v2528_v20  ;;  %v489_v36 = vmul.f32 %v377_v21, %v2532_v24 }
  0xfc   :  { %v507_v37 = vrot.slane %v433_v28, 4  ;;  %v555_v38 = vrot.slane %v441_v29, 4  ;;  %v603_v39 = vrot.slane %v449_v30, 4  ;;  %v651_v40 = vrot.slane %v457_v31, 4 }
  0xfd   :  { %v699_v41 = vrot.slane %v465_v33, 4  ;;  %v747_v42 = vrot.slane %v473_v34, 4  ;;  %v795_v43 = vrot.slane %v481_v35, 4  ;;  %v843_v44 = vrot.slane %v489_v36, 4 }
  0xfe   :  { %v604_v45 = vadd.f32 %v603_v39, %v449_v30  ;;  %v652_v46 = vadd.f32 %v651_v40, %v457_v31  ;;  %v431_v53 = vmul.f32 %v369_v26, %v2522_v15  ;;  %v439_v54 = vmul.f32 %v369_v26, %v2526_v19 }
  0xff   :  { %v700_v47 = vadd.f32 %v699_v41, %v465_v33  ;;  %v748_v48 = vadd.f32 %v747_v42, %v473_v34  ;;  %v796_v49 = vadd.f32 %v795_v43, %v481_v35  ;;  %v844_v50 = vadd.f32 %v843_v44, %v489_v36  ;;  %v2548_v51 = vpop.f32.mrb[12].mxu0 }
 0x100   :  { %v605_v52 = vrot.slane %v604_v45, 2  ;;  %v2552_v55 = vpop.f32.mrb[13].mxu0  ;;  %v2554_v56 = vadd.f32 %v507_v37, %v433_v28  ;;  %v2556_v57 = vadd.f32 %v555_v38, %v441_v29  ;;  %v653_v61 = vrot.slane %v652_v46, 2 }
 0x101   :  { %v2558_v58 = vpop.f32.mrb[14].mxu0  ;;  %v701_v62 = vrot.slane %v700_v47, 2  ;;  %v447_v63 = vmul.f32 %v369_v26, %v2520_v14  ;;  %v455_v1 = vmul.f32 %v369_v26, %v2524_v18  ;;  %v749_v4 = vrot.slane %v748_v48, 2 }
 0x102   :  { %v2562_v2 = vpop.f32.mrb[15].mxu0  ;;  %v2564_v3 = vadd.f32 %v605_v52, %v604_v45  ;;  %v797_v6 = vrot.slane %v796_v49, 2  ;;  %v845_v7 = vrot.slane %v844_v50, 2  ;;  %v463_v8 = vmul.f32 %v369_v26, %v2530_v23 }
 0x103   :  { %v471_v9 = vmul.f32 %v369_v26, %v2534_v25  ;;  %v479_v10 = vmul.f32 %v369_v26, %v2528_v20  ;;  %v487_v12 = vmul.f32 %v369_v26, %v2532_v24  ;;  %v495_v13 = vrot.slane %v431_v53, 4 }
 0x104   :  { %3892 = vst [vmem:[#allocation5_spill] sm:$0xff] %v2564_v3  ;;  %v543_v16 = vrot.slane %v439_v54, 4  ;;  %v591_v17 = vrot.slane %v447_v63, 4  ;;  %v639_v21 = vrot.slane %v455_v1, 4  ;;  %v687_v22 = vrot.slane %v463_v8, 4 }
 0x105   :  { %v735_v28 = vrot.slane %v471_v9, 4  ;;  %v783_v29 = vrot.slane %v479_v10, 4  ;;  %v831_v30 = vrot.slane %v487_v12, 4  ;;  %v2570_v31 = vadd.f32 %v653_v61, %v652_v46 }
 0x106   :  { %v2572_v33 = vadd.f32 %v495_v13, %v431_v53  ;;  %v592_v34 = vadd.f32 %v591_v17, %v447_v63  ;;  %v640_v35 = vadd.f32 %v639_v21, %v455_v1  ;;  %v688_v37 = vadd.f32 %v687_v22, %v463_v8 }
 0x107   :  { %3893 = vst [vmem:[#allocation6_spill] sm:$0xff] %v2570_v31  ;;  %v2574_v36 = vpop.f32.mrb[16].mxu0  ;;  %v736_v38 = vadd.f32 %v735_v28, %v471_v9  ;;  %v784_v39 = vadd.f32 %v783_v29, %v479_v10  ;;  %v832_v26 = vadd.f32 %v831_v30, %v487_v12  ;;  %v2578_v41 = vadd.f32 %v701_v62, %v700_v47 }
 0x108   :  { %v2576_v40 = vpop.f32.mrb[17].mxu0  ;;  %v2580_v42 = vadd.f32 %v543_v16, %v439_v54  ;;  %v593_v43 = vrot.slane %v592_v34, 2  ;;  %v641_v44 = vrot.slane %v640_v35, 2  ;;  %v689_v46 = vrot.slane %v688_v37, 2 }
 0x109   :  { %3894 = vst [vmem:[#allocation7_spill] sm:$0xff] %v2578_v41  ;;  %v2582_v45 = vpop.f32.mrb[18].mxu0  ;;  %v737_v52 = vrot.slane %v736_v38, 2  ;;  %v785_v53 = vrot.slane %v784_v39, 2  ;;  %v833_v61 = vrot.slane %v832_v26, 2  ;;  %v2586_v1 = vadd.f32 %v749_v4, %v748_v48 }
 0x10a   :  { %v2584_v63 = vpop.f32.mrb[19].mxu0  ;;  %v2588_v8 = vadd.f32 %v797_v6, %v796_v49  ;;  %v2590_v9 = vadd.f32 %v593_v43, %v592_v34  ;;  %v380_v47 = vadd.f32 %v2536_v27, %v2514_v0  ;;  %v2594_v54 = vadd.f32 %v845_v7, %v844_v50  ;;  %v158_v0 = vpop.permute.xlu0 %157 }
 0x10b   :  { %3895 = vst [vmem:[#allocation8_spill] sm:$0xff] %v2586_v1  ;;  %v2597_v10 = vadd.f32 %v641_v44, %v640_v35  ;;  %v2599_v12 = vadd.f32 %v689_v46, %v688_v37  ;;  %v372_v4 = vadd.f32 %v2542_v32, %v2512_v60  ;;  %v2611_v27 = vadd.f32 %v737_v52, %v736_v38 }
 0x10c   :  { %3896 = vst [vmem:[#allocation9_spill] sm:$0xff] %v2588_v8  ;;  %3897 = vst [vmem:[#allocation10_spill] sm:$0xff] %v2590_v9  ;;  %v2603_v48 = vmul.f32 %v380_v47, %v2522_v15  ;;  %v2606_v49 = vmul.f32 %v380_v47, %v2526_v19  ;;  %v2613_v50 = vadd.f32 %v785_v53, %v784_v39 }
 0x10d   :  { %3898 = vst [vmem:[#allocation11_spill] sm:$0xff] %v2594_v54  ;;  %3899 = vst [vmem:[#allocation12_spill] sm:$0xff] %v2597_v10  ;;  %v2615_v6 = vadd.f32 %v833_v61, %v832_v26  ;;  %v450_v7 = vmul.f32 %v380_v47, %v2520_v14  ;;  %v458_v16 = vmul.f32 %v380_v47, %v2524_v18  ;;  %v163_v10 = vpop.permute.xlu1 %162 }
 0x10e   :  { %3900 = vst [vmem:[#allocation13_spill] sm:$0xff] %v2599_v12  ;;  %3901 = vst [vmem:[#allocation14_spill] sm:$0xff] %v2611_v27  ;;  %v466_v17 = vmul.f32 %v380_v47, %v2530_v23  ;;  %v474_v21 = vmul.f32 %v380_v47, %v2534_v25  ;;  %v482_v28 = vmul.f32 %v380_v47, %v2528_v20 }
 0x10f   :  { %3902 = vst [vmem:[#allocation15_spill] sm:$0xff] %v2613_v50  ;;  %3903 = vst [vmem:[#allocation16_spill] sm:$0xff] %v2615_v6  ;;  %v2621_v22 = vpop.f32.mrb[20].mxu0  ;;  %v490_v29 = vmul.f32 %v380_v47, %v2532_v24  ;;  %v609_v34 = vrot.slane %v450_v7, 4  ;;  %v657_v35 = vrot.slane %v458_v16, 4  ;;  %v432_v44 = vmul.f32 %v372_v4, %v2522_v15 }
 0x110   :  { %v2627_v30 = vpop.f32.mrb[21].mxu0  ;;  %v705_v37 = vrot.slane %v466_v17, 4  ;;  %v753_v38 = vrot.slane %v474_v21, 4  ;;  %v801_v26 = vrot.slane %v482_v28, 4  ;;  %v440_v46 = vmul.f32 %v372_v4, %v2526_v19 }
 0x111   :  { %v2629_v39 = vpop.f32.mrb[22].mxu0  ;;  %v849_v43 = vrot.slane %v490_v29, 4  ;;  %v2638_v32 = vadd.f32 %v609_v34, %v450_v7  ;;  %v448_v59 = vmul.f32 %v372_v4, %v2520_v14  ;;  %v456_v13 = vmul.f32 %v372_v4, %v2524_v18 }
 0x112   :  { %v2633_v52 = vpop.f32.mrb[23].mxu0  ;;  %v2644_v62 = vadd.f32 %v657_v35, %v458_v16  ;;  %v2646_v54 = vadd.f32 %v705_v37, %v466_v17  ;;  %v2648_v8 = vadd.f32 %v753_v38, %v474_v21  ;;  %v2650_v53 = vadd.f32 %v801_v26, %v482_v28  ;;  %v2665_v26 = vpop.permute.xlu0 %167 }
 0x113   :  { %3904 = vst [vmem:[#allocation17_spill] sm:$0xff] %v2633_v52  ;;  %3905 = vst [vmem:[#allocation18_spill] sm:$0xff] %v2638_v32  ;;  %v2653_v7 = vadd.f32 %v849_v43, %v490_v29  ;;  %v464_v34 = vmul.f32 %v372_v4, %v2530_v23  ;;  %v472_v61 = vmul.f32 %v372_v4, %v2534_v25  ;;  %v501_v35 = vrot.slane %v432_v44, 4 }
 0x114   :  { %3906 = vst [vmem:[#allocation19_spill] sm:$0xff] %v2646_v54  ;;  %3907 = vst [vmem:[#allocation20_spill] sm:$0xff] %v2648_v8  ;;  %v480_v60 = vmul.f32 %v372_v4, %v2528_v20  ;;  %v488_v16 = vmul.f32 %v372_v4, %v2532_v24  ;;  %v549_v17 = vrot.slane %v440_v46, 4  ;;  %v597_v37 = vrot.slane %v448_v59, 4 }
 0x115   :  { %3908 = vst [vmem:[#allocation21_spill] sm:$0xff] %v2650_v53  ;;  %3909 = vst [vmem:[#allocation22_spill] sm:$0xff] %v2653_v7  ;;  %v645_v21 = vrot.slane %v456_v13, 4  ;;  %v693_v38 = vrot.slane %v464_v34, 4  ;;  %v741_v28 = vrot.slane %v472_v61, 4  ;;  %v2661_v12 = vadd.f32 %v501_v35, %v432_v44 }
 0x116   :  { %v789_v43 = vrot.slane %v480_v60, 4  ;;  %v837_v47 = vrot.slane %v488_v16, 4  ;;  %v598_v6 = vadd.f32 %v597_v37, %v448_v59  ;;  %v2663_v41 = vadd.f32 %v549_v17, %v440_v46 }
 0x117   :  { %v646_v50 = vadd.f32 %v645_v21, %v456_v13  ;;  %v694_v1 = vadd.f32 %v693_v38, %v464_v34  ;;  %v742_v27 = vadd.f32 %v741_v28, %v472_v61  ;;  %v2669_v13 = vadd.f32 %v2548_v51, %v158_v0 }
 0x118   :  { %v790_v4 = vadd.f32 %v789_v43, %v480_v60  ;;  %v838_v31 = vadd.f32 %v837_v47, %v488_v16  ;;  %v599_v9 = vrot.slane %v598_v6, 2  ;;  %v385_v61 = vadd.f32 %v2552_v55, %v2516_v5 }
 0x119   :  { %v647_v32 = vrot.slane %v646_v50, 2  ;;  %v695_v3 = vrot.slane %v694_v1, 2  ;;  %v743_v52 = vrot.slane %v742_v27, 2  ;;  %v2681_v16 = vmul.f32 %v2669_v13, %v2520_v14 }
 0x11a   :  { %v791_v54 = vrot.slane %v790_v4, 2  ;;  %v839_v59 = vrot.slane %v838_v31, 2  ;;  %v2673_v60 = vadd.f32 %v599_v9, %v598_v6  ;;  %v2685_v51 = vmul.f32 %v2669_v13, %v2524_v18 }
 0x11b   :  { %v2687_v0 = vadd.f32 %v647_v32, %v646_v50  ;;  %v2689_v35 = vadd.f32 %v695_v3, %v694_v1  ;;  %v2691_v9 = vadd.f32 %v743_v52, %v742_v27  ;;  %v2700_v17 = vmul.f32 %v2669_v13, %v2530_v23  ;;  %v173_v50 = vpop.permute.xlu1 %172  ;;  %v178_v27 = vpop.permute.xlu0 %177 }
 0x11c   :  { %3910 = vst [vmem:[#allocation23_spill] sm:$0xff] %v2685_v51  ;;  %v2693_v6 = vadd.f32 %v791_v54, %v790_v4  ;;  %v2696_v55 = vadd.f32 %v839_v59, %v838_v31  ;;  %v2704_v37 = vmul.f32 %v2669_v13, %v2534_v25  ;;  %v2708_v3 = vmul.f32 %v2669_v13, %v2528_v20 }
 0x11d   :  { %3913 = vst [vmem:[#allocation26_spill] sm:$0xff] %v2700_v17  ;;  %v2712_v1 = vmul.f32 %v2669_v13, %v2532_v24  ;;  %v2715_v31 = vmul.f32 %v385_v61, %v2522_v15  ;;  %v2718_v54 = vmul.f32 %v385_v61, %v2526_v19  ;;  %v451_v32 = vmul.f32 %v385_v61, %v2520_v14 }
 0x11e   :  { %3911 = vst [vmem:[#allocation24_spill] sm:$0xff] %v2693_v6  ;;  %3912 = vst [vmem:[#allocation25_spill] sm:$0xff] %v2696_v55  ;;  %v459_v52 = vmul.f32 %v385_v61, %v2524_v18  ;;  %v467_v21 = vmul.f32 %v385_v61, %v2530_v23  ;;  %v475_v38 = vmul.f32 %v385_v61, %v2534_v25 }
 0x11f   :  { %3914 = vst [vmem:[#allocation27_spill] sm:$0xff] %v2704_v37  ;;  %3915 = vst [vmem:[#allocation28_spill] sm:$0xff] %v2708_v3  ;;  %v483_v43 = vmul.f32 %v385_v61, %v2528_v20  ;;  %v491_v4 = vmul.f32 %v385_v61, %v2532_v24  ;;  %v388_v59 = vadd.f32 %v2562_v2, %v2518_v11  ;;  %v615_v46 = vrot.slane %v451_v32, 4  ;;  %v183_v2 = vpop.permute.xlu1 %182  ;;  %v188_v51 = vpop.permute.xlu0 %187 }
 0x120   :  { %3916 = vst [vmem:[#allocation29_spill] sm:$0xff] %v2712_v1  ;;  %v663_v44 = vrot.slane %v459_v52, 4  ;;  %v711_v29 = vrot.slane %v467_v21, 4  ;;  %v759_v5 = vrot.slane %v475_v38, 4  ;;  %v2742_v37 = vadd.f32 %v2558_v58, %v163_v10 }
 0x121   :  { %v807_v34 = vrot.slane %v483_v43, 4  ;;  %v855_v47 = vrot.slane %v491_v4, 4  ;;  %v2730_v1 = vmul.f32 %v388_v59, %v2520_v14  ;;  %v2733_v7 = vmul.f32 %v388_v59, %v2524_v18 }
 0x122   :  { %v2739_v53 = vadd.f32 %v615_v46, %v451_v32  ;;  %v2745_v8 = vmul.f32 %v388_v59, %v2530_v23  ;;  %v2748_v17 = vmul.f32 %v388_v59, %v2534_v25  ;;  %v2750_v28 = vadd.f32 %v663_v44, %v459_v52 }
 0x123   :  { %v2752_v3 = vadd.f32 %v711_v29, %v467_v21  ;;  %v2755_v61 = vmul.f32 %v388_v59, %v2528_v20  ;;  %v2758_v46 = vmul.f32 %v388_v59, %v2532_v24  ;;  %v2760_v32 = vadd.f32 %v759_v5, %v475_v38 }
 0x124   :  { %3917 = vst [vmem:[#allocation30_spill] sm:$0xff] %v2748_v17  ;;  %v2762_v58 = vadd.f32 %v807_v34, %v483_v43  ;;  %v2764_v10 = vadd.f32 %v855_v47, %v491_v4  ;;  %v2771_v52 = vadd.f32 %v2574_v36, %v178_v27  ;;  %v2777_v34 = vadd.f32 %v2576_v40, %v2665_v26  ;;  %v2788_v4 = vpop.permute.xlu1 %192 }
 0x125   :  { %3918 = vst [vmem:[#allocation31_spill] sm:$0xff] %v2755_v61  ;;  %3919 = vst [vmem:[#allocation32_spill] sm:$0xff] %v2758_v46  ;;  %v2780_v47 = vadd.f32 %v2582_v45, %v183_v2  ;;  %v436_v38 = vmul.f32 %v388_v59, %v2522_v15  ;;  %v437_v43 = vmul.f32 %v2669_v13, %v2522_v15  ;;  %v3923_v45 = vrot.slane %v2572_v33, 2 }
 0x126   :  { %3920 = vst [vmem:[#allocation33_spill] sm:$0xff] %v2760_v32  ;;  %3921 = vst [vmem:[#allocation34_spill] sm:$0xff] %v2762_v58  ;;  %v438_v36 = vmul.f32 %v2742_v37, %v2522_v15  ;;  %v444_v27 = vmul.f32 %v388_v59, %v2526_v19  ;;  %v2791_v5 = vadd.f32 %v2584_v63, %v173_v50  ;;  %v3924_v2 = vrot.slane %v2661_v12, 2  ;;  %v198_v15 = vpop.permute.xlu0 %197 }
 0x127   :  { %3922 = vst [vmem:[#allocation35_spill] sm:$0xff] %v2764_v10  ;;  %v2795_v40 = vmul.f32 %v2669_v13, %v2526_v19  ;;  %v498_v26 = vadd.f32 %v3923_v45, %v2572_v33  ;;  %v509_v59 = vrot.slane %v2554_v56, 2  ;;  %v3925_v29 = vrot.slane %v2603_v48, 4 }
 0x128   :  { %v504_v21 = vadd.f32 %v3924_v2, %v2661_v12  ;;  %v519_v50 = vrot.slane %v2715_v31, 4  ;;  %v525_v44 = vrot.slane %v436_v38, 4  ;;  %v2809_v13 = vadd.f32 %v2621_v22, %v198_v15  ;;  %v203_v15 = vpop.permute.xlu1 %202 }
 0x129   :  { %v514_v63 = vadd.f32 %v3925_v29, %v2603_v48  ;;  %v2812_v55 = vadd.f32 %v2627_v30, %v188_v51  ;;  %v531_v33 = vrot.slane %v437_v43, 4  ;;  %v537_v45 = vrot.slane %v438_v36, 4 }
 0x12a   :  { %v510_v12 = vadd.f32 %v509_v59, %v2554_v56  ;;  %v520_v11 = vadd.f32 %v519_v50, %v2715_v31  ;;  %v526_v46 = vadd.f32 %v525_v44, %v436_v38  ;;  %v499_v10 = vrot.slane %v498_v26, 1 }
 0x12b   :  { %v515_v2 = vrot.slane %v514_v63, 2  ;;  %v505_v61 = vrot.slane %v504_v21, 1  ;;  %v532_v48 = vadd.f32 %v531_v33, %v437_v43  ;;  %v538_v29 = vadd.f32 %v537_v45, %v438_v36 }
 0x12c   :  { %v511_v6 = vrot.slane %v510_v12, 1  ;;  %v521_v20 = vrot.slane %v520_v11, 2  ;;  %v527_v22 = vrot.slane %v526_v46, 2  ;;  %v3926_v51 = vrot.slane %v2580_v42, 2 }
 0x12d   :  { %v516_v24 = vadd.f32 %v515_v2, %v514_v63  ;;  %v533_v58 = vrot.slane %v532_v48, 2  ;;  %v539_v30 = vrot.slane %v538_v29, 2  ;;  %v3927_v56 = vrot.slane %v2663_v41, 2 }
 0x12e   :  { %v546_v17 = vadd.f32 %v3926_v51, %v2580_v42  ;;  %v2823_v44 = vadd.f32 %v2629_v39, %v203_v15  ;;  %v522_v43 = vadd.f32 %v521_v20, %v520_v11  ;;  %v528_v36 = vadd.f32 %v527_v22, %v526_v46 }
 0x12f   :  { %v552_v31 = vadd.f32 %v3927_v56, %v2663_v41  ;;  %v517_v38 = vrot.slane %v516_v24, 1  ;;  %v534_v59 = vadd.f32 %v533_v58, %v532_v48  ;;  %v540_v63 = vadd.f32 %v539_v30, %v538_v29 }
 0x130   :  { %3928 = vst [vmem:[#allocation36_spill] sm:$0xff] %v2823_v44  ;;  %v547_v50 = vrot.slane %v546_v17, 1  ;;  %v446_v45 = vmul.f32 %v2742_v37, %v2526_v19  ;;  %v2827_v2 = vadd.f32 %v499_v10, %v498_v26  ;;  %v2829_v42 = vadd.f32 %v505_v61, %v504_v21 }
 0x131   :  { %v553_v33 = vrot.slane %v552_v31, 1  ;;  %v557_v51 = vrot.slane %v2556_v57, 2  ;;  %v2832_v41 = vadd.f32 %v511_v6, %v510_v12  ;;  %v2834_v39 = vadd.f32 %v517_v38, %v516_v24 }
 0x132   :  { %v523_v15 = vrot.slane %v522_v43, 1  ;;  %v529_v11 = vrot.slane %v528_v36, 1  ;;  %v535_v46 = vrot.slane %v534_v59, 1  ;;  %v3929_v19 = vrot.slane %v2606_v49, 4 }
 0x133   :  { %v2836_v20 = vadd.f32 %v553_v33, %v552_v31  ;;  %v558_v58 = vadd.f32 %v557_v51, %v2556_v57  ;;  %v541_v26 = vrot.slane %v540_v63, 1  ;;  %v2842_v61 = vadd.f32 %v547_v50, %v546_v17 }
 0x134   :  { %v562_v10 = vadd.f32 %v3929_v19, %v2606_v49  ;;  %v567_v21 = vrot.slane %v2718_v54, 4  ;;  %v573_v6 = vrot.slane %v444_v27, 4  ;;  %v579_v48 = vrot.slane %v2795_v40, 4 }
 0x135   :  { %v559_v12 = vrot.slane %v558_v58, 1  ;;  %v585_v29 = vrot.slane %v446_v45, 4  ;;  %v879_v57 = vmax.f32 %v2827_v2, %v2829_v42  ;;  %v886_v49 = vmax.f32 %v2842_v61, %v2836_v20 }
 0x136   :  { %v563_v24 = vrot.slane %v562_v10, 2  ;;  %v568_v22 = vadd.f32 %v567_v21, %v2718_v54  ;;  %v574_v30 = vadd.f32 %v573_v6, %v444_v27  ;;  %v580_v31 = vadd.f32 %v579_v48, %v2795_v40 }
 0x137   :  { %v2851_v56 = vadd.f32 %v559_v12, %v558_v58  ;;  %v586_v38 = vadd.f32 %v585_v29, %v446_v45  ;;  %v2854_v50 = vadd.f32 %v523_v15, %v522_v43  ;;  %v880_v19 = vmax.f32 %v879_v57, %v2832_v41 }
 0x138   :  { %v564_v17 = vadd.f32 %v563_v24, %v562_v10  ;;  %v569_v33 = vrot.slane %v568_v22, 2  ;;  %v575_v51 = vrot.slane %v574_v30, 2  ;;  %v581_v27 = vrot.slane %v580_v31, 2  ;;  %v3931_v24 = vld [vmem:[#allocation17_spill] sm:$0xff] }
 0x139   :  { %v587_v21 = vrot.slane %v586_v38, 2  ;;  %v887_v6 = vmax.f32 %v886_v49, %v2851_v56  ;;  %v2858_v32 = vadd.f32 %v529_v11, %v528_v36  ;;  %v881_v10 = vmax.f32 %v880_v19, %v2834_v39  ;;  %v3932_v19 = vld [vmem:[#allocation5_spill] sm:$0xff] }
 0x13a   :  { %v565_v54 = vrot.slane %v564_v17, 1  ;;  %v570_v44 = vadd.f32 %v569_v33, %v568_v22  ;;  %v576_v58 = vadd.f32 %v575_v51, %v574_v30  ;;  %v582_v40 = vadd.f32 %v581_v27, %v580_v31  ;;  %v3933_v27 = vld [vmem:[#allocation18_spill] sm:$0xff] }
 0x13b   :  { %v588_v43 = vadd.f32 %v587_v21, %v586_v38  ;;  %v3930_v45 = vlaneseq  ;;  %v2866_v48 = vadd.f32 %v3931_v24, %v2788_v4  ;;  %v882_v49 = vmax.f32 %v881_v10, %v2854_v50 }
 0x13c   :  { %v2861_v12 = vadd.f32 %v565_v54, %v564_v17  ;;  %v571_v29 = vrot.slane %v570_v44, 1  ;;  %v577_v57 = vrot.slane %v576_v58, 1  ;;  %v536_v36 = vadd.f32 %v535_v46, %v534_v59 }
 0x13d   :  { %v1375_v15 = vshrl.u32 %v3930_v45, 7  ;;  %v583_v11 = vrot.slane %v582_v40, 1  ;;  %v589_v22 = vrot.slane %v588_v43, 1  ;;  %v542_v33 = vadd.f32 %v541_v26, %v540_v63 }
 0x13e   :  { %v888_v30 = vmax.f32 %v887_v6, %v2861_v12  ;;  %v2870_v17 = vadd.f32 %v571_v29, %v570_v44  ;;  %v2872_v31 = vadd.f32 %v577_v57, %v576_v58  ;;  %v883_v38 = vmax.f32 %v882_v49, %v2858_v32 }
 0x13f   :  { %v2875_v51 = vsub.s32 0, %v1375_v15  ;;  %v454_v4 = vmul.f32 %v2742_v37, %v2520_v14  ;;  %v607_v54 = vrot.slane %v3932_v19, 1  ;;  %v3934_v59 = vrot.slane %v3933_v27, 2  ;;  %v3935_v14 = vld [vmem:[#allocation10_spill] sm:$0xff] }
 0x140   :  { %v884_v21 = vmax.f32 %v883_v38, %v536_v36  ;;  %v889_v63 = vmax.f32 %v888_v30, %v2870_v17  ;;  %v2886_v44 = vmul.f32 %v2742_v37, %v2524_v18  ;;  %v617_v26 = vrot.slane %v2739_v53, 2 }
 0x141   :  { %v612_v46 = vadd.f32 %v3934_v59, %v3933_v27  ;;  %v2889_v6 = vadd.f32 %v583_v11, %v582_v40  ;;  %v2891_v58 = vadd.f32 %v589_v22, %v588_v43  ;;  %v3936_v10 = vrot.slane %v3935_v14, 1 }
 0x142   :  { %v3937_v15 = vrot.slane %v2673_v60, 1  ;;  %v885_v29 = vmax.f32 %v884_v21, %v542_v33  ;;  %v890_v18 = vmax.f32 %v889_v63, %v2872_v31  ;;  %v2905_v57 = vadd.f32 %v607_v54, %v3932_v19 }
 0x143   :  { %v2896_v45 = vadd.f32 %v3936_v10, %v3935_v14  ;;  %v3938_v40 = vrot.slane %v2730_v1, 4  ;;  %v613_v49 = vrot.slane %v612_v46, 1  ;;  %v2911_v11 = vadd.f32 %v617_v26, %v2739_v53 }
 0x144   :  { %v2901_v24 = vadd.f32 %v3937_v15, %v2673_v60  ;;  %v627_v22 = vrot.slane %v2681_v16, 4  ;;  %v633_v30 = vrot.slane %v454_v4, 4  ;;  %v891_v60 = vmax.f32 %v890_v18, %v2889_v6 }
 0x145   :  { %v622_v43 = vadd.f32 %v3938_v40, %v2730_v1  ;;  %v935_v38 = vsub.f32 %v2827_v2, %v885_v29  ;;  %v936_v27 = vsub.f32 %v2829_v42, %v885_v29  ;;  %v937_v19 = vsub.f32 %v2832_v41, %v885_v29 }
 0x146   :  { %v938_v54 = vsub.f32 %v2834_v39, %v885_v29  ;;  %v939_v59 = vsub.f32 %v2854_v50, %v885_v29  ;;  %v940_v1 = vsub.f32 %v2858_v32, %v885_v29  ;;  %v941_v21 = vsub.f32 %v536_v36, %v885_v29 }
 0x147   :  { %v892_v53 = vmax.f32 %v891_v60, %v2891_v58  ;;  %v942_v63 = vsub.f32 %v542_v33, %v885_v29  ;;  %v999_v26 = vmul.f32 1.442695, %v935_v38  ;;  %v623_v14 = vrot.slane %v622_v43, 2  ;;  %v3939_v60 = vld [vmem:[#allocation12_spill] sm:$0xff] }
 0x148   :  { %v1001_v10 = vmul.f32 1.442695, %v936_v27  ;;  %v1003_v15 = vmul.f32 1.442695, %v937_v19  ;;  %v1005_v18 = vmul.f32 1.442695, %v938_v54  ;;  %v2922_v2 = vadd.f32 %v613_v49, %v612_v46 }
 0x149   :  { %v943_v42 = vsub.f32 %v2842_v61, %v892_v53  ;;  %v944_v41 = vsub.f32 %v2836_v20, %v892_v53  ;;  %v945_v39 = vsub.f32 %v2851_v56, %v892_v53  ;;  %v946_v50 = vsub.f32 %v2861_v12, %v892_v53 }
 0x14a   :  { %v947_v32 = vsub.f32 %v2870_v17, %v892_v53  ;;  %v948_v36 = vsub.f32 %v2872_v31, %v892_v53  ;;  %v949_v33 = vsub.f32 %v2889_v6, %v892_v53  ;;  %v950_v29 = vsub.f32 %v2891_v58, %v892_v53 }
 0x14b   :  { %2156 = vpow2.f32 %v999_v26  ;;  %v1007_v40 = vmul.f32 1.442695, %v939_v59  ;;  %v628_v46 = vadd.f32 %v627_v22, %v2681_v16  ;;  %v634_v49 = vadd.f32 %v633_v30, %v454_v4 }
 0x14c   :  { %2158 = vpow2.f32 %v1001_v10  ;;  %v1009_v61 = vmul.f32 1.442695, %v940_v1  ;;  %v624_v20 = vadd.f32 %v623_v14, %v622_v43  ;;  %v3940_v56 = vrot.slane %v3939_v60, 1  ;;  %v3941_v1 = vld [vmem:[#allocation6_spill] sm:$0xff] }
 0x14d   :  { %2160 = vpow2.f32 %v1003_v15  ;;  %v1011_v17 = vmul.f32 1.442695, %v941_v21  ;;  %v1013_v31 = vmul.f32 1.442695, %v942_v63  ;;  %v1015_v38 = vmul.f32 1.442695, %v943_v42 }
 0x14e   :  { %v2936_v12 = vadd.f32 %v3940_v56, %v3939_v60  ;;  %2162 = vpow2.f32 %v1005_v18  ;;  %v1017_v6 = vmul.f32 1.442695, %v944_v41  ;;  %v1019_v58 = vmul.f32 1.442695, %v945_v39 }
 0x14f   :  { %v1021_v27 = vmul.f32 1.442695, %v946_v50  ;;  %2164 = vpow2.f32 %v1007_v40  ;;  %v619_v16 = vrot.slane %v2911_v11, 1  ;;  %v629_v4 = vrot.slane %v628_v46, 2 }
 0x150   :  { %v635_v43 = vrot.slane %v634_v49, 2  ;;  %2166 = vpow2.f32 %v1009_v61  ;;  %v1023_v22 = vmul.f32 1.442695, %v947_v32  ;;  %v1025_v30 = vmul.f32 1.442695, %v948_v36  ;;  %v3945_v32 = vld [vmem:[#allocation23_spill] sm:$0xff] }
 0x151   :  { %v625_v19 = vrot.slane %v624_v20, 1  ;;  %2168 = vpow2.f32 %v1011_v17  ;;  %v1027_v54 = vmul.f32 1.442695, %v949_v33  ;;  %v630_v59 = vadd.f32 %v629_v4, %v628_v46 }
 0x152   :  { %v655_v21 = vrot.slane %v3941_v1, 1  ;;  %2170 = vpow2.f32 %v1013_v31  ;;  %v1029_v53 = vmul.f32 1.442695, %v950_v29  ;;  %v2940_v63 = vadd.f32 %v635_v43, %v634_v49 }
 0x153   :  { %v665_v26 = vrot.slane %v2750_v28, 2  ;;  %2172 = vpow2.f32 %v1015_v38  ;;  %v2944_v14 = vadd.f32 %v619_v16, %v2911_v11  ;;  %v3942_v10 = vrot.slane %v2687_v0, 1 }
 0x154   :  { %v3943_v18 = vrot.slane %v2733_v7, 4  ;;  %2174 = vpow2.f32 %v1017_v6  ;;  %v2954_v41 = vadd.f32 %v625_v19, %v624_v20  ;;  %v3944_v39 = vrot.slane %v2644_v62, 2 }
 0x155   :  { %v2949_v15 = vadd.f32 %v3942_v10, %v2687_v0  ;;  %v675_v11 = vrot.slane %v3945_v32, 4  ;;  %v2960_v36 = vpop.eup %2156  ;;  %2176 = vpow2.f32 %v1019_v58  ;;  %v631_v33 = vrot.slane %v630_v59, 1 }
 0x156   :  { %v670_v42 = vadd.f32 %v3943_v18, %v2733_v7  ;;  %v660_v50 = vadd.f32 %v3944_v39, %v2644_v62  ;;  %v2963_v0 = vadd.f32 %v655_v21, %v3941_v1  ;;  %v2965_v40 = vpop.eup %2158  ;;  %2178 = vpow2.f32 %v1021_v27 }
 0x157   :  { %v666_v46 = vadd.f32 %v665_v26, %v2750_v28  ;;  %v676_v49 = vadd.f32 %v675_v11, %v3945_v32  ;;  %v2970_v62 = vpop.eup %2160  ;;  %2180 = vpow2.f32 %v1023_v22  ;;  %v1191_v61 = vrot.slane %v2965_v40, 7 }
 0x158   :  { %v671_v29 = vrot.slane %v670_v42, 2  ;;  %v681_v60 = vrot.slane %v2886_v44, 4  ;;  %v2974_v56 = vpop.eup %2162  ;;  %2182 = vpow2.f32 %v1025_v30  ;;  %v1194_v17 = vrot.slane %v2970_v62, 6 }
 0x159   :  { %v661_v31 = vrot.slane %v660_v50, 1  ;;  %v677_v38 = vrot.slane %v676_v49, 2  ;;  %v2977_v6 = vpop.eup %2164  ;;  %2184 = vpow2.f32 %v1027_v54  ;;  %v1193_v28 = vsel %vm1192_vm1, %v1191_v61, %v2960_v36 }
 0x15a   :  { %v672_v20 = vadd.f32 %v671_v29, %v670_v42  ;;  %v1197_v58 = vrot.slane %v2974_v56, 5  ;;  %v2982_v27 = vadd.f32 %v631_v33, %v630_v59  ;;  %v2984_v16 = vpop.eup %2166  ;;  %2186 = vpow2.f32 %v1029_v53 }
 0x15b   :  { %v1196_v4 = vsel %vm1195_vm2, %v1194_v17, %v1193_v28  ;;  %v1200_v43 = vrot.slane %v2977_v6, 4  ;;  %v667_v22 = vrot.slane %v666_v46, 1  ;;  %v2988_v30 = vpop.eup %2168  ;;  %v1203_v54 = vrot.slane %v2984_v16, 3 }
 0x15c   :  { %v1199_v19 = vsel %vm1198_vm3, %v1197_v58, %v1196_v4  ;;  %v673_v1 = vrot.slane %v672_v20, 1  ;;  %v682_v21 = vadd.f32 %v681_v60, %v2886_v44  ;;  %v2993_v26 = vpop.eup %2170  ;;  %v1206_v53 = vrot.slane %v2988_v30, 2 }
 0x15d   :  { %v1202_v59 = vsel %vm1201_vm4, %v1200_v43, %v1199_v19  ;;  %v678_v10 = vadd.f32 %v677_v38, %v676_v49  ;;  %v893_v18 = vmax.f32 %v2896_v45, %v2901_v24  ;;  %v2999_v42 = vpop.eup %2172  ;;  %v1209_v32 = vrot.slane %v2993_v26, 1 }
 0x15e   :  { %v1205_v39 = vsel %vm1204_vm5, %v1203_v54, %v1202_v59  ;;  %v683_v11 = vrot.slane %v682_v21, 2  ;;  %v900_v44 = vmax.f32 %v2936_v12, %v2949_v15  ;;  %v3005_v33 = vpop.eup %2174  ;;  %v3008_v61 = vadd.f32 %v661_v31, %v660_v50 }
 0x15f   :  { %v1208_v29 = vsel %vm1207_vm6, %v1206_v53, %v1205_v39  ;;  %v3010_v49 = vadd.f32 %v667_v22, %v666_v46  ;;  %v894_v60 = vmax.f32 %v893_v18, %v2905_v57  ;;  %v3013_v17 = vpop.eup %2176  ;;  %v1212_v28 = vrot.slane %v3005_v33, 7 }
 0x160   :  { %v1211_v38 = vsel %vm1210_vm7, %v1209_v32, %v1208_v29  ;;  %v684_v58 = vadd.f32 %v683_v11, %v682_v21  ;;  %v901_v4 = vmax.f32 %v900_v44, %v2963_v0  ;;  %v3018_v43 = vpop.eup %2178  ;;  %v1214_v19 = vrot.slane %v3013_v17, 6 }
 0x161   :  { %3946 = vst [vmem:[#allocation17_spill] sm:$0xff] %v3018_v43  ;;  %v1318_v54 = vrot.slane %v1211_v38, 4  ;;  %v3021_v50 = vadd.f32 %v673_v1, %v672_v20  ;;  %v895_v46 = vmax.f32 %v894_v60, %v2922_v2  ;;  %v3024_v31 = vpop.eup %2180  ;;  %v1213_v22 = vsel %vm1192_vm1, %v1212_v28, %v2999_v42 }
 0x162   :  { %3947 = vst [vmem:[#allocation5_spill] sm:$0xff] %v3024_v31  ;;  %v1216_v59 = vrot.slane %v3018_v43, 5  ;;  %v679_v53 = vrot.slane %v678_v10, 1  ;;  %v902_v21 = vmax.f32 %v901_v4, %v3008_v61  ;;  %v3030_v18 = vpop.eup %2182  ;;  %v1215_v39 = vsel %vm1195_vm2, %v1214_v19, %v1213_v22 }
 0x163   :  { %3948 = vst [vmem:[#allocation18_spill] sm:$0xff] %v3030_v18  ;;  %v1218_v32 = vrot.slane %v3024_v31, 4  ;;  %v1319_v20 = vadd.f32 %v1318_v54, %v1211_v38  ;;  %v896_v1 = vmax.f32 %v895_v46, %v2944_v14  ;;  %v3035_v11 = vpop.eup %2184  ;;  %v1220_v29 = vrot.slane %v3030_v18, 3 }
 0x164   :  { %3949 = vst [vmem:[#allocation10_spill] sm:$0xff] %v3035_v11  ;;  %v1217_v44 = vsel %vm1198_vm3, %v1216_v59, %v1215_v39  ;;  %v685_v60 = vrot.slane %v684_v58, 1  ;;  %v903_v28 = vmax.f32 %v902_v21, %v3010_v49  ;;  %v3040_v7 = vpop.eup %2186  ;;  %v1222_v19 = vrot.slane %v3035_v11, 2 }
 0x165   :  { %3950 = vst [vmem:[#allocation12_spill] sm:$0xff] %v3040_v7  ;;  %v1219_v4 = vsel %vm1201_vm4, %v1218_v32, %v1217_v44  ;;  %v1320_v22 = vrot.slane %v1319_v20, 2  ;;  %v897_v38 = vmax.f32 %v896_v1, %v2954_v41  ;;  %v1224_v46 = vrot.slane %v3040_v7, 1 }
 0x166   :  { %v1221_v54 = vsel %vm1204_vm5, %v1220_v29, %v1219_v4  ;;  %v3047_v31 = vadd.f32 %v679_v53, %v678_v10  ;;  %v904_v59 = vmax.f32 %v903_v28, %v3021_v50  ;;  %v3951_v18 = vrot.slane %v2940_v63, 1  ;;  %v3952_v4 = vld [vmem:[#allocation19_spill] sm:$0xff] }
 0x167   :  { %v1223_v39 = vsel %vm1207_vm6, %v1222_v19, %v1221_v54  ;;  %v1321_v21 = vadd.f32 %v1320_v22, %v1319_v20  ;;  %v898_v44 = vmax.f32 %v897_v38, %v2982_v27  ;;  %v686_v1 = vadd.f32 %v685_v60, %v684_v58 }
 0x168   :  { %v638_v32 = vadd.f32 %v3951_v18, %v2940_v63  ;;  %v1225_v11 = vsel %vm1210_vm7, %v1224_v46, %v1223_v39  ;;  %v905_v29 = vmax.f32 %v904_v59, %v3047_v31  ;;  %v3953_v10 = vrot.slane %v3952_v4, 2  ;;  %v3954_v18 = vld [vmem:[#allocation7_spill] sm:$0xff] }
 0x169   :  { %v1322_v7 = vrot.slane %v1321_v21, 1  ;;  %v1324_v28 = vrot.slane %v1225_v11, 4  ;;  %v3062_v20 = vmul.f32 %v2742_v37, %v2530_v23  ;;  %v3066_v63 = vmul.f32 %v2742_v37, %v2534_v25 }
 0x16a   :  { %v708_v53 = vadd.f32 %v3953_v10, %v3952_v4  ;;  %v899_v43 = vmax.f32 %v898_v44, %v638_v32  ;;  %v906_v19 = vmax.f32 %v905_v29, %v686_v1  ;;  %v703_v58 = vrot.slane %v3954_v18, 1 }
 0x16b   :  { %v1323_v22 = vadd.f32 %v1322_v7, %v1321_v21  ;;  %v1325_v38 = vadd.f32 %v1324_v28, %v1225_v11 }
 0x16c   :  { %v709_v60 = vrot.slane %v708_v53, 1  ;;  %v951_v54 = vsub.f32 %v2896_v45, %v899_v43  ;;  %v952_v46 = vsub.f32 %v2901_v24, %v899_v43  ;;  %v953_v59 = vsub.f32 %v2905_v57, %v899_v43 }
 0x16d   :  { %v954_v39 = vsub.f32 %v2922_v2, %v899_v43  ;;  %v955_v23 = vsub.f32 %v2944_v14, %v899_v43  ;;  %v956_v44 = vsub.f32 %v2954_v41, %v899_v43  ;;  %v1326_v29 = vrot.slane %v1325_v38, 2 }
 0x16e   :  { %2188 = vrcp.f32 %v1323_v22  ;;  %v957_v25 = vsub.f32 %v2982_v27, %v899_v43  ;;  %v958_v4 = vsub.f32 %v638_v32, %v899_v43  ;;  %v959_v7 = vsub.f32 %v2936_v12, %v906_v19  ;;  %v3955_v32 = vld [vmem:[#allocation13_spill] sm:$0xff] }
 0x16f   :  { %v960_v11 = vsub.f32 %v2949_v15, %v906_v19  ;;  %v961_v45 = vsub.f32 %v2963_v0, %v906_v19  ;;  %v962_v24 = vsub.f32 %v3008_v61, %v906_v19  ;;  %v1327_v57 = vadd.f32 %v1326_v29, %v1325_v38 }
 0x170   :  { %v963_v2 = vsub.f32 %v3010_v49, %v906_v19  ;;  %v964_v14 = vsub.f32 %v3021_v50, %v906_v19  ;;  %v965_v41 = vsub.f32 %v3047_v31, %v906_v19  ;;  %v966_v21 = vsub.f32 %v686_v1, %v906_v19 }
 0x171   :  { %v1031_v10 = vmul.f32 1.442695, %v951_v54  ;;  %v1033_v28 = vmul.f32 1.442695, %v952_v46  ;;  %v1035_v27 = vmul.f32 1.442695, %v953_v59  ;;  %v3095_v31 = vadd.f32 %v703_v58, %v3954_v18 }
 0x172   :  { %v1328_v43 = vrot.slane %v1327_v57, 1  ;;  %v3956_v12 = vrot.slane %v3955_v32, 1  ;;  %v3957_v0 = vrot.slane %v2689_v35, 1  ;;  %v713_v49 = vrot.slane %v2752_v3, 2 }
 0x173   :  { %2190 = vpow2.f32 %v1031_v10  ;;  %v1037_v50 = vmul.f32 1.442695, %v954_v39  ;;  %v3958_v1 = vrot.slane %v2745_v8, 4  ;;  %v1039_v38 = vmul.f32 1.442695, %v955_v23 }
 0x174   :  { %v3086_v15 = vadd.f32 %v3956_v12, %v3955_v32  ;;  %v3091_v61 = vadd.f32 %v3957_v0, %v2689_v35  ;;  %v1329_v22 = vadd.f32 %v1328_v43, %v1327_v57  ;;  %2192 = vpow2.f32 %v1033_v28  ;;  %v3960_v57 = vld [vmem:[#allocation14_spill] sm:$0xff] }
 0x175   :  { %v718_v19 = vadd.f32 %v3958_v1, %v2745_v8  ;;  %v3100_v54 = vadd.f32 %v709_v60, %v708_v53  ;;  %2194 = vpow2.f32 %v1035_v27  ;;  %v1041_v46 = vmul.f32 1.442695, %v956_v44 }
 0x176   :  { %v1043_v35 = vmul.f32 1.442695, %v957_v25  ;;  %v1045_v59 = vmul.f32 1.442695, %v958_v4  ;;  %2196 = vrcp.f32 %v1329_v22  ;;  %v3102_v29 = vmul.f32 1.442695, %v959_v7 }
 0x177   :  { %v3104_v39 = vmul.f32 1.442695, %v960_v11  ;;  %v3106_v18 = vmul.f32 1.442695, %v961_v45  ;;  %v3108_v58 = vmul.f32 1.442695, %v962_v24  ;;  %v3115_v53 = vadd.f32 %v713_v49, %v2752_v3 }
 0x178   :  { %v3110_v10 = vmul.f32 1.442695, %v963_v2  ;;  %v3112_v8 = vmul.f32 1.442695, %v964_v14  ;;  %v2189_v60 = vpop.eup %2188  ;;  %2198 = vpow2.f32 %v1037_v50  ;;  %v3117_v23 = vmul.f32 1.442695, %v965_v41 }
 0x179   :  { %v3119_v44 = vmul.f32 1.442695, %v966_v21  ;;  %v719_v25 = vrot.slane %v718_v19, 2  ;;  %v1377_v4 = vrot.slane %v2189_v60, %v2875_v51  ;;  %2200 = vpow2.f32 %v1039_v38  ;;  %v3959_v7 = vld [vmem:[#allocation26_spill] sm:$0xff] }
 0x17a   :  { %v723_v11 = vrot.slane %v3959_v7, 4  ;;  %v729_v45 = vrot.slane %v3062_v20, 4  ;;  %2202 = vpow2.f32 %v1041_v46  ;;  %v3961_v3 = vrot.slane %v3960_v57, 1 }
 0x17b   :  { %v3962_v14 = vrot.slane %v2691_v9, 1  ;;  %v1406_v21 = vmul.f32 %v2960_v36, %v1377_v4  ;;  %v1407_v28 = vmul.f32 %v2965_v40, %v1377_v4  ;;  %v1408_v27 = vmul.f32 %v2970_v62, %v1377_v4 }
 0x17c   :  { %v3128_v2 = vadd.f32 %v3961_v3, %v3960_v57  ;;  %v1409_v43 = vmul.f32 %v2974_v56, %v1377_v4  ;;  %v1410_v32 = vmul.f32 %v2977_v6, %v1377_v4  ;;  %v1411_v12 = vmul.f32 %v2984_v16, %v1377_v4 }
 0x17d   :  { %v3133_v41 = vadd.f32 %v3962_v14, %v2691_v9  ;;  %v1412_v0 = vmul.f32 %v2988_v30, %v1377_v4  ;;  %v3143_v49 = vmul.f32 %v2993_v26, %v1377_v4  ;;  %v3145_v50 = vpop.eup %2190  ;;  %v1473_v9 = vrot.slane %v1406_v21, %v2875_v51 }
 0x17e   :  { %v1477_v36 = vrot.slane %v1407_v28, %v2875_v51  ;;  %v1481_v40 = vrot.slane %v1408_v27, %v2875_v51  ;;  %v1485_v62 = vrot.slane %v1409_v43, %v2875_v51  ;;  %v3151_v56 = vpop.eup %2192  ;;  %v1489_v6 = vrot.slane %v1410_v32, %v2875_v51 }
 0x17f   :  { %v1493_v16 = vrot.slane %v1411_v12, %v2875_v51  ;;  %v1497_v30 = vrot.slane %v1412_v0, %v2875_v51  ;;  %v3156_v26 = vadd.f32 %v719_v25, %v718_v19  ;;  %v3158_v1 = vpop.eup %2194  ;;  %v1726_v22 = vmul.f32 %v1473_v9, %v2777_v34  ;;  %v3963_v19 = vld [vmem:[#allocation8_spill] sm:$0xff] }
 0x180   :  { %v1727_v38 = vmul.f32 %v1477_v36, %v2791_v5  ;;  %2204 = vpow2.f32 %v1043_v35  ;;  %v3163_v46 = vadd.f32 %v723_v11, %v3959_v7  ;;  %v2197_v60 = vpop.eup %2196  ;;  %v1501_v4 = vrot.slane %v3143_v49, %v2875_v51  ;;  %v3965_v36 = vld [vmem:[#allocation5_spill] sm:$0xff] }
 0x181   :  { %v1728_v57 = vmul.f32 %v1481_v40, %v2771_v52  ;;  %v3169_v3 = vadd.f32 %v729_v45, %v3062_v20  ;;  %v1381_v14 = vrot.slane %v2197_v60, %v2875_v51  ;;  %v1729_v21 = vmul.f32 %v1485_v62, %v2780_v47  ;;  %v3966_v62 = vld [vmem:[#allocation18_spill] sm:$0xff] }
 0x182   :  { %v1790_v28 = vadd.f32 %v1727_v38, %v1726_v22  ;;  %2206 = vpow2.f32 %v1045_v59  ;;  %v3174_v35 = vpop.eup %2198  ;;  %v1730_v7 = vmul.f32 %v1489_v6, %v2812_v55  ;;  %v1731_v11 = vmul.f32 %v1493_v16, %v2866_v48  ;;  %v3964_v59 = vld [vmem:[#allocation17_spill] sm:$0xff]  ;;  %v3967_v16 = vld [vmem:[#allocation10_spill] sm:$0xff]  ;;  %v3968_v22 = vld [vmem:[#allocation12_spill] sm:$0xff] }
 0x183   :  { %v3179_v27 = vmul.f32 %v1497_v30, %v2809_v13  ;;  %v1226_v20 = vrot.slane %v3151_v56, 7  ;;  %v3182_v45 = vpop.eup %2200  ;;  %v1414_v43 = vmul.f32 %v2999_v42, %v1381_v14  ;;  %v1415_v32 = vmul.f32 %v3005_v33, %v1381_v14 }
 0x184   :  { %v1416_v12 = vmul.f32 %v3013_v17, %v1381_v14  ;;  %v1417_v0 = vmul.f32 %v3964_v59, %v1381_v14  ;;  %v3188_v9 = vpop.eup %2202  ;;  %v1418_v40 = vmul.f32 %v3965_v36, %v1381_v14  ;;  %v1419_v6 = vmul.f32 %v3966_v62, %v1381_v14 }
 0x185   :  { %v1420_v30 = vmul.f32 %v3967_v16, %v1381_v14  ;;  %v1421_v38 = vmul.f32 %v3968_v22, %v1381_v14  ;;  %v1505_v60 = vrot.slane %v1414_v43, %v2875_v51  ;;  %v1509_v42 = vrot.slane %v1415_v32, %v2875_v51 }
 0x186   :  { %v1513_v33 = vrot.slane %v1416_v12, %v2875_v51  ;;  %v1517_v17 = vrot.slane %v1417_v0, %v2875_v51  ;;  %v1521_v59 = vrot.slane %v1418_v40, %v2875_v51  ;;  %2208 = vpow2.f32 %v3102_v29 }
 0x187   :  { %v1228_v36 = vrot.slane %v3158_v1, 6  ;;  %v1230_v62 = vrot.slane %v3174_v35, 5  ;;  %v1525_v16 = vrot.slane %v1419_v6, %v2875_v51  ;;  %v1529_v14 = vrot.slane %v1420_v30, %v2875_v51 }
 0x188   :  { %v1734_v43 = vmul.f32 %v1505_v60, %v2777_v34  ;;  %v1735_v32 = vmul.f32 %v1509_v42, %v2791_v5  ;;  %v1533_v12 = vrot.slane %v1421_v38, %v2875_v51  ;;  %v1736_v0 = vmul.f32 %v1513_v33, %v2771_v52 }
 0x189   :  { %v1737_v40 = vmul.f32 %v1517_v17, %v2780_v47  ;;  %v1738_v29 = vmul.f32 %v1521_v59, %v2812_v55  ;;  %v1791_v25 = vadd.f32 %v1790_v28, %v1728_v57  ;;  %2210 = vpow2.f32 %v3104_v39 }
 0x18a   :  { %v3210_v22 = vpop.eup %2204  ;;  %v1797_v24 = vadd.f32 %v1735_v32, %v1734_v43  ;;  %v1227_v6 = vsel %vm1192_vm1, %v1226_v20, %v3145_v50  ;;  %2212 = vpow2.f32 %v3106_v18  ;;  %v1232_v38 = vrot.slane %v3182_v45, 4  ;;  %v3969_v43 = vld [vmem:[#allocation36_spill] sm:$0xff] }
 0x18b   :  { %v1229_v30 = vsel %vm1195_vm2, %v1228_v36, %v1227_v6  ;;  %v1234_v60 = vrot.slane %v3188_v9, 3  ;;  %v1792_v33 = vadd.f32 %v1791_v25, %v1729_v21  ;;  %2214 = vpow2.f32 %v3108_v58 }
 0x18c   :  { %v3219_v42 = vpop.eup %2206  ;;  %v1798_v17 = vadd.f32 %v1797_v24, %v1736_v0  ;;  %v1231_v57 = vsel %vm1198_vm3, %v1230_v62, %v1229_v30  ;;  %2216 = vpow2.f32 %v3110_v10  ;;  %v1236_v18 = vrot.slane %v3210_v22, 2 }
 0x18d   :  { %v1233_v39 = vsel %vm1201_vm4, %v1232_v38, %v1231_v57  ;;  %v1238_v28 = vrot.slane %v3219_v42, 1  ;;  %v1793_v20 = vadd.f32 %v1792_v33, %v1730_v7  ;;  %2218 = vpow2.f32 %v3112_v8 }
 0x18e   :  { %v1799_v59 = vadd.f32 %v1798_v17, %v1737_v40  ;;  %v1235_v36 = vsel %vm1204_vm5, %v1234_v60, %v1233_v39  ;;  %v1739_v24 = vmul.f32 %v1525_v16, %v2866_v48  ;;  %2220 = vpow2.f32 %v3117_v23  ;;  %v3973_v60 = vld [vmem:[#allocation33_spill] sm:$0xff] }
 0x18f   :  { %v1237_v58 = vsel %vm1207_vm6, %v1236_v18, %v1235_v36  ;;  %v725_v10 = vrot.slane %v3163_v46, 2  ;;  %v1794_v25 = vadd.f32 %v1793_v20, %v1731_v11  ;;  %2222 = vpow2.f32 %v3119_v44  ;;  %v3975_v20 = vld [vmem:[#allocation30_spill] sm:$0xff] }
 0x190   :  { %v1800_v21 = vadd.f32 %v1799_v59, %v1738_v29  ;;  %v1239_v62 = vsel %vm1210_vm7, %v1238_v28, %v1237_v58  ;;  %v3235_v7 = vpop.eup %2208  ;;  %v1733_v8 = vmul.f32 %v1501_v4, %v3969_v43  ;;  %v3970_v23 = vrot.slane %v3115_v53, 1  ;;  %v3971_v4 = vld [vmem:[#allocation20_spill] sm:$0xff] }
 0x191   :  { %v1330_v16 = vrot.slane %v1239_v62, 4  ;;  %v731_v11 = vrot.slane %v3169_v3, 2  ;;  %v1740_v0 = vmul.f32 %v1529_v14, %v2809_v13  ;;  %v1795_v44 = vadd.f32 %v1794_v25, %v3179_v27 }
 0x192   :  { %v3244_v32 = vadd.f32 %v3970_v23, %v3115_v53  ;;  %v1801_v40 = vadd.f32 %v1800_v21, %v1739_v24  ;;  %v3250_v29 = vadd.f32 %v725_v10, %v3163_v46  ;;  %v1741_v6 = vmul.f32 %v1533_v12, %v3969_v43 }
 0x193   :  { %v1331_v49 = vadd.f32 %v1330_v16, %v1239_v62  ;;  %v3972_v30 = vrot.slane %v3971_v4, 2  ;;  %v761_v53 = vrot.slane %v3973_v60, 2  ;;  %v3257_v33 = vpop.eup %2210  ;;  %v1796_v17 = vadd.f32 %v1795_v44, %v1733_v8 }
 0x194   :  { %v1802_v57 = vadd.f32 %v1801_v40, %v1740_v0  ;;  %v721_v14 = vrot.slane %v3156_v26, 1  ;;  %v732_v27 = vadd.f32 %v731_v11, %v3169_v3  ;;  %v3261_v39 = vpop.eup %2212  ;;  %v1240_v46 = vrot.slane %v3257_v33, 7 }
 0x195   :  { %v756_v38 = vadd.f32 %v3972_v30, %v3971_v4  ;;  %v1332_v12 = vrot.slane %v1331_v49, 2  ;;  %v3974_v18 = vrot.slane %v3963_v19, 1  ;;  %v3976_v59 = vrot.slane %v3975_v20, 4  ;;  %v3272_v24 = vpop.eup %2214 }
 0x196   :  { %v1803_v58 = vadd.f32 %v1802_v57, %v1741_v6  ;;  %v1242_v10 = vrot.slane %v3261_v39, 6  ;;  %v727_v3 = vrot.slane %v3250_v29, 1  ;;  %v762_v25 = vadd.f32 %v761_v53, %v3973_v60  ;;  %v3277_v21 = vpop.eup %2216 }
 0x197   :  { %v3267_v28 = vadd.f32 %v3974_v18, %v3963_v19  ;;  %v766_v36 = vadd.f32 %v3976_v59, %v3975_v20  ;;  %v1241_v62 = vsel %vm1192_vm1, %v1240_v46, %v3235_v7  ;;  %v1244_v19 = vrot.slane %v3272_v24, 5  ;;  %v3282_v23 = vpop.eup %2218 }
 0x198   :  { %v1333_v8 = vadd.f32 %v1332_v12, %v1331_v49  ;;  %v757_v16 = vrot.slane %v756_v38, 1  ;;  %v1846_v11 = vpack.c.bf16 %v1803_v58, %v1796_v17  ;;  %v1243_v0 = vsel %vm1195_vm2, %v1242_v10, %v1241_v62  ;;  %v3286_v6 = vpop.eup %2220  ;;  %v3978_v12 = vld [vmem:[#allocation27_spill] sm:$0xff] }
 0x199   :  { %v1246_v44 = vrot.slane %v3277_v21, 4  ;;  %v733_v40 = vrot.slane %v732_v27, 1  ;;  %v1245_v4 = vsel %vm1198_vm3, %v1244_v19, %v1243_v0  ;;  %v1248_v30 = vrot.slane %v3282_v23, 3  ;;  %v3290_v57 = vpop.eup %2222 }
 0x19a   :  { %v1334_v60 = vrot.slane %v1333_v8, 1  ;;  %v767_v53 = vrot.slane %v766_v36, 2  ;;  %3977 = vst [vmem:[#allocation6_spill] sm:$0xff] %v3290_v57  ;;  %2125 = vmatprep.mubr.bf16.mxu1 %v1846_v11  ;;  %v1250_v17 = vrot.slane %v3286_v6, 2  ;;  %v763_v46 = vrot.slane %v762_v25, 1 }
 0x19b   :  { %v1247_v49 = vsel %vm1201_vm4, %v1246_v44, %v1245_v4  ;;  %v771_v18 = vrot.slane %v3978_v12, 4  ;;  %v1252_v59 = vrot.slane %v3290_v57, 1  ;;  %v777_v0 = vrot.slane %v3066_v63, 4 }
 0x19c   :  { %v1249_v20 = vsel %vm1204_vm5, %v1248_v30, %v1247_v49  ;;  %v1335_v58 = vadd.f32 %v1334_v60, %v1333_v8  ;;  %v768_v10 = vadd.f32 %v767_v53, %v766_v36  ;;  %v907_v11 = vmax.f32 %v3086_v15, %v3091_v61 }
 0x19d   :  { %v1251_v62 = vsel %vm1207_vm6, %v1250_v17, %v1249_v20  ;;  %v772_v19 = vadd.f32 %v771_v18, %v3978_v12  ;;  %v914_v30 = vmax.f32 %v3128_v2, %v3133_v41  ;;  %v778_v36 = vadd.f32 %v777_v0, %v3066_v63 }
 0x19e   :  { %v1253_v44 = vsel %vm1210_vm7, %v1252_v59, %v1251_v62  ;;  %2224 = vrcp.f32 %v1335_v58  ;;  %v769_v4 = vrot.slane %v768_v10, 1  ;;  %v908_v8 = vmax.f32 %v907_v11, %v3095_v31  ;;  %v3980_v11 = vld [vmem:[#allocation21_spill] sm:$0xff] }
 0x19f   :  { %v1336_v49 = vrot.slane %v1253_v44, 4  ;;  %v773_v57 = vrot.slane %v772_v19, 2  ;;  %v3308_v60 = vadd.f32 %v721_v14, %v3156_v26  ;;  %v3310_v53 = vadd.f32 %v757_v16, %v756_v38 }
 0x1a0   :  { %v3312_v17 = vadd.f32 %v763_v46, %v762_v25  ;;  %v915_v12 = vmax.f32 %v914_v30, %v3267_v28  ;;  %v779_v59 = vrot.slane %v778_v36, 2  ;;  %v909_v58 = vmax.f32 %v908_v8, %v3100_v54  ;;  %v3983_v30 = vld [vmem:[#allocation3_spill] sm:$0xff] }
 0x1a1   :  { %v1337_v18 = vadd.f32 %v1336_v49, %v1253_v44  ;;  %v774_v20 = vadd.f32 %v773_v57, %v772_v19  ;;  %v3317_v62 = vadd.f32 %v727_v3, %v3250_v29  ;;  %v3319_v63 = vadd.f32 %v733_v40, %v732_v27  ;;  %v3979_v57 = vld [vmem:[#allocation9_spill] sm:$0xff]  ;;  %v3982_v3 = vld [vmem:[#allocation34_spill] sm:$0xff] }
 0x1a2   :  { %v3321_v0 = vadd.f32 %v769_v4, %v768_v10  ;;  %v916_v26 = vmax.f32 %v915_v12, %v3310_v53  ;;  %v780_v25 = vadd.f32 %v779_v59, %v778_v36  ;;  %v910_v16 = vmax.f32 %v909_v58, %v3244_v32 }
 0x1a3   :  { %v1338_v38 = vrot.slane %v1337_v18, 2  ;;  %v775_v14 = vrot.slane %v774_v20, 1  ;;  %v799_v19 = vrot.slane %v3979_v57, 1  ;;  %v3981_v44 = vrot.slane %v3980_v11, 2 }
 0x1a4   :  { %v917_v46 = vmax.f32 %v916_v26, %v3312_v17  ;;  %v809_v27 = vrot.slane %v3982_v3, 2  ;;  %v781_v10 = vrot.slane %v780_v25, 1  ;;  %v911_v4 = vmax.f32 %v910_v16, %v3308_v60 }
 0x1a5   :  { %v804_v29 = vadd.f32 %v3981_v44, %v3980_v11  ;;  %v1339_v40 = vadd.f32 %v1338_v38, %v1337_v18  ;;  %v3334_v49 = vmul.f32 %v2742_v37, %v3983_v30  ;;  %v3336_v36 = vadd.f32 %v775_v14, %v774_v20  ;;  %v3984_v11 = vld [vmem:[#allocation4_spill] sm:$0xff]  ;;  %v3986_v38 = vld [vmem:[#allocation15_spill] sm:$0xff] }
 0x1a6   :  { %v918_v8 = vmax.f32 %v917_v46, %v3321_v0  ;;  %v810_v59 = vadd.f32 %v809_v27, %v3982_v3  ;;  %v912_v26 = vmax.f32 %v911_v4, %v3317_v62  ;;  %v3343_v18 = vmul.f32 %v2742_v37, %v3984_v11  ;;  %v3989_v46 = vld [vmem:[#allocation24_spill] sm:$0xff] }
 0x1a7   :  { %v805_v12 = vrot.slane %v804_v29, 1  ;;  %v1340_v58 = vrot.slane %v1339_v40, 1  ;;  %v3987_v16 = vrot.slane %v3986_v38, 1  ;;  %v3350_v20 = vadd.f32 %v781_v10, %v780_v25 }
 0x1a8   :  { %3985 = vst [vmem:[#allocation23_spill] sm:$0xff] %v3343_v18  ;;  %v2225_v30 = vpop.eup %2224  ;;  %v919_v14 = vmax.f32 %v918_v8, %v3336_v36  ;;  %v3990_v3 = vrot.slane %v3989_v46, 1  ;;  %v3359_v4 = vadd.f32 %v799_v19, %v3979_v57  ;;  %v3363_v18 = vmax.f32 %v912_v26, %v3319_v63 }
 0x1a9   :  { %v3348_v44 = vadd.f32 %v3987_v16, %v3986_v38  ;;  %v1341_v37 = vadd.f32 %v1340_v58, %v1339_v40  ;;  %v1385_v11 = vrot.slane %v2225_v30, %v2875_v51  ;;  %v3991_v38 = vld [vmem:[#allocation31_spill] sm:$0xff]  ;;  %v3371_v16 = vadd.f32 %v805_v12, %v804_v29 }
 0x1aa   :  { %v3356_v27 = vadd.f32 %v3990_v3, %v3989_v46  ;;  %v3992_v25 = vrot.slane %v3991_v38, 4  ;;  %v3369_v8 = vmax.f32 %v919_v14, %v3350_v20  ;;  %v811_v46 = vrot.slane %v810_v59, 1  ;;  %v3993_v3 = vld [vmem:[#allocation28_spill] sm:$0xff] }
 0x1ab   :  { %3988 = vst [vmem:[#allocation19_spill] sm:$0xff] %v3348_v44  ;;  %v819_v44 = vrot.slane %v3993_v3, 4  ;;  %2226 = vrcp.f32 %v1341_v37  ;;  %v1422_v57 = vmul.f32 %v3145_v50, %v1385_v11  ;;  %v1423_v19 = vmul.f32 %v3151_v56, %v1385_v11 }
 0x1ac   :  { %v814_v10 = vadd.f32 %v3992_v25, %v3991_v38  ;;  %v1424_v40 = vmul.f32 %v3158_v1, %v1385_v11  ;;  %v1425_v58 = vmul.f32 %v3174_v35, %v1385_v11  ;;  %v1426_v26 = vmul.f32 %v3182_v45, %v1385_v11 }
 0x1ad   :  { %v1427_v30 = vmul.f32 %v3188_v9, %v1385_v11  ;;  %v1428_v14 = vmul.f32 %v3210_v22, %v1385_v11  ;;  %v1429_v29 = vmul.f32 %v3219_v42, %v1385_v11  ;;  %v1537_v12 = vrot.slane %v1422_v57, %v2875_v51 }
 0x1ae   :  { %v1541_v37 = vrot.slane %v1423_v19, %v2875_v51  ;;  %v1545_v50 = vrot.slane %v1424_v40, %v2875_v51  ;;  %v1549_v56 = vrot.slane %v1425_v58, %v2875_v51  ;;  %v1553_v1 = vrot.slane %v1426_v26, %v2875_v51 }
 0x1af   :  { %v815_v38 = vrot.slane %v814_v10, 2  ;;  %v3388_v35 = vadd.f32 %v819_v44, %v3993_v3  ;;  %v1557_v45 = vrot.slane %v1427_v30, %v2875_v51  ;;  %v1742_v9 = vmul.f32 %v1537_v12, %v2777_v34 }
 0x1b0   :  { %v1743_v22 = vmul.f32 %v1541_v37, %v2791_v5  ;;  %v3393_v42 = vadd.f32 %v811_v46, %v810_v59  ;;  %v1561_v11 = vrot.slane %v1428_v14, %v2875_v51  ;;  %v1565_v25 = vrot.slane %v1429_v29, %v2875_v51 }
 0x1b1   :  { %v1744_v57 = vmul.f32 %v1545_v50, %v2771_v52  ;;  %v1745_v19 = vmul.f32 %v1549_v56, %v2780_v47  ;;  %v1746_v40 = vmul.f32 %v1553_v1, %v2812_v55  ;;  %v967_v3 = vsub.f32 %v3086_v15, %v3363_v18 }
 0x1b2   :  { %v1804_v44 = vadd.f32 %v1743_v22, %v1742_v9  ;;  %v968_v58 = vsub.f32 %v3091_v61, %v3363_v18  ;;  %v969_v59 = vsub.f32 %v3095_v31, %v3363_v18  ;;  %v970_v46 = vsub.f32 %v3100_v54, %v3363_v18 }
 0x1b3   :  { %v971_v26 = vsub.f32 %v3244_v32, %v3363_v18  ;;  %v972_v30 = vsub.f32 %v3308_v60, %v3363_v18  ;;  %v973_v29 = vsub.f32 %v3317_v62, %v3363_v18  ;;  %v974_v15 = vsub.f32 %v3319_v63, %v3363_v18 }
 0x1b4   :  { %v1805_v14 = vadd.f32 %v1804_v44, %v1744_v57  ;;  %v975_v61 = vsub.f32 %v3128_v2, %v3369_v8  ;;  %v976_v31 = vsub.f32 %v3133_v41, %v3369_v8  ;;  %v977_v54 = vsub.f32 %v3267_v28, %v3369_v8 }
 0x1b5   :  { %v978_v32 = vsub.f32 %v3310_v53, %v3369_v8  ;;  %v979_v60 = vsub.f32 %v3312_v17, %v3369_v8  ;;  %v2227_v12 = vpop.eup %2226  ;;  %v980_v63 = vsub.f32 %v3321_v0, %v3369_v8  ;;  %v981_v2 = vsub.f32 %v3336_v36, %v3369_v8 }
 0x1b6   :  { %v1806_v62 = vadd.f32 %v1805_v14, %v1745_v19  ;;  %v982_v41 = vsub.f32 %v3350_v20, %v3369_v8  ;;  %v1389_v18 = vrot.slane %v2227_v12, %v2875_v51  ;;  %v1747_v28 = vmul.f32 %v1557_v45, %v2866_v48  ;;  %v3994_v14 = vld [vmem:[#allocation6_spill] sm:$0xff]  ;;  %v3998_v20 = vld [vmem:[#allocation25_spill] sm:$0xff] }
 0x1b7   :  { %v3434_v37 = vadd.f32 %v815_v38, %v814_v10  ;;  %v825_v53 = vrot.slane %v3334_v49, 4  ;;  %v1748_v50 = vmul.f32 %v1561_v11, %v2809_v13  ;;  %v1749_v56 = vmul.f32 %v1565_v25, %v3969_v43 }
 0x1b8   :  { %v1807_v1 = vadd.f32 %v1806_v62, %v1746_v40  ;;  %v1063_v9 = vmul.f32 1.442695, %v967_v3  ;;  %v1430_v22 = vmul.f32 %v3235_v7, %v1389_v18  ;;  %v1431_v57 = vmul.f32 %v3257_v33, %v1389_v18 }
 0x1b9   :  { %v1432_v19 = vmul.f32 %v3261_v39, %v1389_v18  ;;  %v1433_v44 = vmul.f32 %v3272_v24, %v1389_v18  ;;  %v1434_v45 = vmul.f32 %v3277_v21, %v1389_v18  ;;  %v1435_v10 = vmul.f32 %v3282_v23, %v1389_v18 }
 0x1ba   :  { %v1436_v38 = vmul.f32 %v3286_v6, %v1389_v18  ;;  %v1437_v11 = vmul.f32 %v3994_v14, %v1389_v18  ;;  %v1569_v25 = vrot.slane %v1430_v22, %v2875_v51  ;;  %v1573_v40 = vrot.slane %v1431_v57, %v2875_v51 }
 0x1bb   :  { %v1577_v7 = vrot.slane %v1432_v19, %v2875_v51  ;;  %v1581_v33 = vrot.slane %v1433_v44, %v2875_v51  ;;  %v1585_v39 = vrot.slane %v1434_v45, %v2875_v51  ;;  %v1589_v24 = vrot.slane %v1435_v10, %v2875_v51 }
 0x1bc   :  { %v1593_v21 = vrot.slane %v1436_v38, %v2875_v51  ;;  %v1065_v3 = vmul.f32 1.442695, %v968_v58  ;;  %v1750_v23 = vmul.f32 %v1569_v25, %v2777_v34  ;;  %v1751_v6 = vmul.f32 %v1573_v40, %v2791_v5 }
 0x1bd   :  { %v1067_v12 = vmul.f32 1.442695, %v969_v59  ;;  %v1069_v62 = vmul.f32 1.442695, %v970_v46  ;;  %v1597_v18 = vrot.slane %v1437_v11, %v2875_v51  ;;  %v1752_v22 = vmul.f32 %v1577_v7, %v2771_v52 }
 0x1be   :  { %v1071_v57 = vmul.f32 1.442695, %v971_v26  ;;  %v1073_v19 = vmul.f32 1.442695, %v972_v30  ;;  %v1753_v44 = vmul.f32 %v1581_v33, %v2780_v47  ;;  %v1808_v45 = vadd.f32 %v1807_v1, %v1747_v28 }
 0x1bf   :  { %v1811_v14 = vadd.f32 %v1751_v6, %v1750_v23  ;;  %2228 = vpow2.f32 %v1063_v9  ;;  %v1754_v10 = vmul.f32 %v1585_v39, %v2812_v55  ;;  %v1755_v58 = vmul.f32 %v1589_v24, %v2866_v48 }
 0x1c0   :  { %v1756_v38 = vmul.f32 %v1593_v21, %v2809_v13  ;;  %2230 = vpow2.f32 %v1065_v3  ;;  %v1809_v59 = vadd.f32 %v1808_v45, %v1748_v50  ;;  %v1075_v11 = vmul.f32 1.442695, %v973_v29  ;;  %v4000_v3 = vld [vmem:[#allocation22_spill] sm:$0xff] }
 0x1c1   :  { %v1812_v46 = vadd.f32 %v1811_v14, %v1752_v22  ;;  %2232 = vpow2.f32 %v1067_v12  ;;  %v1757_v25 = vmul.f32 %v1597_v18, %v3969_v43  ;;  %v1077_v26 = vmul.f32 1.442695, %v974_v15 }
 0x1c2   :  { %2234 = vpow2.f32 %v1069_v62  ;;  %v1079_v30 = vmul.f32 1.442695, %v975_v61  ;;  %v1810_v40 = vadd.f32 %v1809_v59, %v1749_v56  ;;  %v1081_v1 = vmul.f32 1.442695, %v976_v31 }
 0x1c3   :  { %v1813_v28 = vadd.f32 %v1812_v46, %v1753_v44  ;;  %2236 = vpow2.f32 %v1071_v57  ;;  %v1083_v9 = vmul.f32 1.442695, %v977_v54  ;;  %v1085_v7 = vmul.f32 1.442695, %v978_v32 }
 0x1c4   :  { %2238 = vpow2.f32 %v1073_v19  ;;  %v821_v33 = vrot.slane %v3388_v35, 2  ;;  %v817_v50 = vrot.slane %v3434_v37, 1  ;;  %v826_v29 = vadd.f32 %v825_v53, %v3334_v49 }
 0x1c5   :  { %v1814_v39 = vadd.f32 %v1813_v28, %v1754_v10  ;;  %2240 = vpow2.f32 %v1075_v11  ;;  %v1087_v15 = vmul.f32 1.442695, %v979_v60  ;;  %v1089_v61 = vmul.f32 1.442695, %v980_v63  ;;  %v3995_v60 = vld [vmem:[#allocation11_spill] sm:$0xff]  ;;  %v3996_v63 = vld [vmem:[#allocation16_spill] sm:$0xff] }
 0x1c6   :  { %2242 = vpow2.f32 %v1077_v26  ;;  %v822_v31 = vadd.f32 %v821_v33, %v3388_v35  ;;  %v1091_v32 = vmul.f32 1.442695, %v981_v2  ;;  %v827_v56 = vrot.slane %v826_v29, 2 }
 0x1c7   :  { %v1815_v54 = vadd.f32 %v1814_v39, %v1755_v58  ;;  %2244 = vpow2.f32 %v1079_v30  ;;  %v1093_v49 = vmul.f32 1.442695, %v982_v41  ;;  %v847_v53 = vrot.slane %v3995_v60, 1 }
 0x1c8   :  { %2246 = vpow2.f32 %v1081_v1  ;;  %v823_v17 = vrot.slane %v822_v31, 1  ;;  %v3483_v35 = vadd.f32 %v817_v50, %v3434_v37  ;;  %v3997_v36 = vrot.slane %v3996_v63, 1  ;;  %v4002_v37 = vld [vmem:[#allocation35_spill] sm:$0xff] }
 0x1c9   :  { %v3480_v24 = vpop.eup %2228  ;;  %v1816_v0 = vadd.f32 %v1815_v54, %v1756_v38  ;;  %2248 = vpow2.f32 %v1083_v9  ;;  %v3999_v8 = vrot.slane %v3998_v20, 1  ;;  %v4001_v23 = vrot.slane %v4000_v3, 2  ;;  %v4003_v9 = vld [vmem:[#allocation32_spill] sm:$0xff] }
 0x1ca   :  { %v3488_v2 = vadd.f32 %v3997_v36, %v3996_v63  ;;  %v3490_v21 = vpop.eup %2230  ;;  %2250 = vpow2.f32 %v1085_v7  ;;  %v857_v12 = vrot.slane %v4002_v37, 2  ;;  %v3506_v57 = vadd.f32 %v827_v56, %v826_v29 }
 0x1cb   :  { %v3495_v41 = vadd.f32 %v3999_v8, %v3998_v20  ;;  %v3500_v6 = vadd.f32 %v4001_v23, %v4000_v3  ;;  %v3503_v62 = vpop.eup %2232  ;;  %v1817_v18 = vadd.f32 %v1816_v0, %v1757_v25  ;;  %2252 = vpow2.f32 %v1087_v15  ;;  %v4005_v15 = vld [vmem:[#allocation29_spill] sm:$0xff] }
 0x1cc   :  { %v1254_v22 = vrot.slane %v3490_v21, 7  ;;  %v3508_v19 = vpop.eup %2234  ;;  %2254 = vpow2.f32 %v1089_v61  ;;  %v1256_v44 = vrot.slane %v3503_v62, 6  ;;  %v3511_v45 = vadd.f32 %v823_v17, %v822_v31  ;;  %v4006_v31 = vld [vmem:[#allocation23_spill] sm:$0xff] }
 0x1cd   :  { %v3514_v14 = vadd.f32 %v847_v53, %v3995_v60  ;;  %v3516_v10 = vpop.eup %2236  ;;  %v1847_v58 = vpack.c.bf16 %v1817_v18, %v1810_v40  ;;  %2256 = vpow2.f32 %v1091_v32  ;;  %v1258_v59 = vrot.slane %v3508_v19, 5  ;;  %v4007_v60 = vld [vmem:[#allocation19_spill] sm:$0xff] }
 0x1ce   :  { %v1255_v38 = vsel %vm1192_vm1, %v1254_v22, %v3480_v24  ;;  %v3521_v46 = vpop.eup %2238  ;;  %2258 = vpow2.f32 %v1093_v49  ;;  %v1260_v25 = vrot.slane %v3516_v10, 4  ;;  %v853_v26 = vrot.slane %v3500_v6, 1 }
 0x1cf   :  { %v1257_v11 = vsel %vm1195_vm2, %v1256_v44, %v1255_v38  ;;  %v3526_v30 = vpop.eup %2240  ;;  %2126 = vmatmul.mubr.bf16.vlgmr.msra.gmra.mrb[0].mxu1 %v1847_v58  ;;  %v1262_v28 = vrot.slane %v3521_v46, 3  ;;  %v858_v1 = vadd.f32 %v857_v12, %v4002_v37  ;;  %v4004_v7 = vrot.slane %v4003_v9, 4 }
 0x1d0   :  { %v1259_v40 = vsel %vm1198_vm3, %v1258_v59, %v1257_v11  ;;  %v3534_v39 = vpop.eup %2242  ;;  %v1264_v29 = vrot.slane %v3526_v30, 2  ;;  %v867_v61 = vrot.slane %v4005_v15, 4  ;;  %v873_v54 = vrot.slane %v4006_v31, 4 }
 0x1d1   :  { %v862_v33 = vadd.f32 %v4004_v7, %v4003_v9  ;;  %v1261_v50 = vsel %vm1201_vm4, %v1260_v25, %v1259_v40  ;;  %v3540_v32 = vpop.eup %2244  ;;  %v1266_v49 = vrot.slane %v3534_v39, 1  ;;  %v921_v53 = vmax.f32 %v4007_v60, %v3356_v27 }
 0x1d2   :  { %v1263_v56 = vsel %vm1204_vm5, %v1262_v28, %v1261_v50  ;;  %v3546_v0 = vpop.eup %2246  ;;  %v868_v36 = vadd.f32 %v867_v61, %v4005_v15  ;;  %v874_v20 = vadd.f32 %v873_v54, %v4006_v31  ;;  %v928_v8 = vmax.f32 %v3488_v2, %v3495_v41 }
 0x1d3   :  { %v863_v17 = vrot.slane %v862_v33, 2  ;;  %v1265_v63 = vsel %vm1207_vm6, %v1264_v29, %v1263_v56  ;;  %v3553_v3 = vpop.eup %2248  ;;  %v1268_v37 = vrot.slane %v3546_v0, 7  ;;  %v922_v18 = vmax.f32 %v921_v53, %v3359_v4 }
 0x1d4   :  { %v1267_v23 = vsel %vm1210_vm7, %v1266_v49, %v1265_v63  ;;  %v3558_v22 = vpop.eup %2250  ;;  %v1270_v44 = vrot.slane %v3553_v3, 6  ;;  %v869_v38 = vrot.slane %v868_v36, 2  ;;  %v875_v59 = vrot.slane %v874_v20, 2 }
 0x1d5   :  { %v864_v12 = vadd.f32 %v863_v17, %v862_v33  ;;  %v1342_v58 = vrot.slane %v1267_v23, 4  ;;  %v3561_v11 = vpop.eup %2252  ;;  %v1269_v25 = vsel %vm1192_vm1, %v1268_v37, %v3540_v32  ;;  %v1272_v40 = vrot.slane %v3558_v22, 5 }
 0x1d6   :  { %v829_v28 = vrot.slane %v3506_v57, 1  ;;  %v923_v9 = vmax.f32 %v922_v18, %v3371_v16  ;;  %v3568_v7 = vpop.eup %2254  ;;  %v1271_v33 = vsel %vm1195_vm2, %v1270_v44, %v1269_v25  ;;  %v1274_v50 = vrot.slane %v3561_v11, 4 }
 0x1d7   :  { %v1343_v29 = vadd.f32 %v1342_v58, %v1267_v23  ;;  %v859_v15 = vrot.slane %v858_v1, 1  ;;  %v3572_v61 = vpop.eup %2256  ;;  %v1273_v31 = vsel %vm1198_vm3, %v1272_v40, %v1271_v33  ;;  %v1276_v54 = vrot.slane %v3568_v7, 3 }
 0x1d8   :  { %v865_v56 = vrot.slane %v864_v12, 1  ;;  %v870_v49 = vadd.f32 %v869_v38, %v868_v36  ;;  %v3576_v17 = vpop.eup %2258  ;;  %v1275_v53 = vsel %vm1201_vm4, %v1274_v50, %v1273_v31  ;;  %v1278_v63 = vrot.slane %v3572_v61, 2 }
 0x1d9   :  { %v1344_v37 = vrot.slane %v1343_v29, 2  ;;  %v876_v18 = vadd.f32 %v875_v59, %v874_v20  ;;  %v1277_v44 = vsel %vm1204_vm5, %v1276_v54, %v1275_v53  ;;  %v1280_v23 = vrot.slane %v3576_v17, 1 }
 0x1da   :  { %v3583_v58 = vadd.f32 %v853_v26, %v3500_v6  ;;  %v924_v25 = vmax.f32 %v923_v9, %v3393_v42  ;;  %v1279_v40 = vsel %vm1207_vm6, %v1278_v63, %v1277_v44  ;;  %v3587_v38 = vadd.f32 %v859_v15, %v858_v1 }
 0x1db   :  { %v1345_v36 = vadd.f32 %v1344_v37, %v1343_v29  ;;  %v929_v33 = vmax.f32 %v928_v8, %v3514_v14  ;;  %v1281_v50 = vsel %vm1210_vm7, %v1280_v23, %v1279_v40  ;;  %v3591_v31 = vadd.f32 %v865_v56, %v864_v12 }
 0x1dc   :  { %v871_v20 = vrot.slane %v870_v49, 1  ;;  %v925_v59 = vmax.f32 %v924_v25, %v3483_v35  ;;  %v1348_v53 = vrot.slane %v1281_v50, 4  ;;  %v877_v6 = vrot.slane %v876_v18, 1 }
 0x1dd   :  { %v1346_v54 = vrot.slane %v1345_v36, 1  ;;  %v930_v26 = vmax.f32 %v929_v33, %v3583_v58  ;;  %v830_v9 = vadd.f32 %v829_v28, %v3506_v57 }
 0x1de   :  { %v926_v29 = vmax.f32 %v925_v59, %v3511_v45  ;;  %v1349_v15 = vadd.f32 %v1348_v53, %v1281_v50  ;;  %v3598_v63 = vadd.f32 %v871_v20, %v870_v49  ;;  %v878_v37 = vadd.f32 %v877_v6, %v876_v18 }
 0x1df   :  { %v1347_v1 = vadd.f32 %v1346_v54, %v1345_v36  ;;  %v931_v8 = vmax.f32 %v930_v26, %v3587_v38 }
 0x1e0   :  { %v927_v12 = vmax.f32 %v926_v29, %v830_v9  ;;  %v1350_v56 = vrot.slane %v1349_v15, 2 }
 0x1e1   :  { %2260 = vrcp.f32 %v1347_v1  ;;  %v932_v44 = vmax.f32 %v931_v8, %v3591_v31 }
 0x1e2   :  { %v983_v23 = vsub.f32 %v4007_v60, %v927_v12  ;;  %v984_v25 = vsub.f32 %v3356_v27, %v927_v12  ;;  %v985_v57 = vsub.f32 %v3359_v4, %v927_v12  ;;  %v986_v28 = vsub.f32 %v3371_v16, %v927_v12 }
 0x1e3   :  { %v1351_v40 = vadd.f32 %v1350_v56, %v1349_v15  ;;  %v933_v36 = vmax.f32 %v932_v44, %v3598_v63  ;;  %v987_v49 = vsub.f32 %v3393_v42, %v927_v12  ;;  %v988_v33 = vsub.f32 %v3483_v35, %v927_v12 }
 0x1e4   :  { %v989_v50 = vsub.f32 %v3511_v45, %v927_v12  ;;  %v990_v18 = vsub.f32 %v830_v9, %v927_v12  ;;  %v1097_v54 = vmul.f32 1.442695, %v984_v25  ;;  %v1095_v26 = vmul.f32 1.442695, %v983_v23 }
 0x1e5   :  { %v1352_v20 = vrot.slane %v1351_v40, 1  ;;  %v934_v59 = vmax.f32 %v933_v36, %v878_v37  ;;  %v1099_v29 = vmul.f32 1.442695, %v985_v57  ;;  %v1101_v1 = vmul.f32 1.442695, %v986_v28 }
 0x1e6   :  { %v1105_v15 = vmul.f32 1.442695, %v988_v33 }
 0x1e7   :  { %v1353_v60 = vadd.f32 %v1352_v20, %v1351_v40  ;;  %v991_v27 = vsub.f32 %v3488_v2, %v934_v59  ;;  %v992_v4 = vsub.f32 %v3495_v41, %v934_v59  ;;  %v993_v16 = vsub.f32 %v3514_v14, %v934_v59 }
 0x1e8   :  { %v994_v53 = vsub.f32 %v3583_v58, %v934_v59  ;;  %v995_v6 = vsub.f32 %v3587_v38, %v934_v59  ;;  %v996_v42 = vsub.f32 %v3591_v31, %v934_v59  ;;  %v997_v35 = vsub.f32 %v3598_v63, %v934_v59 }
 0x1e9   :  { %2262 = vrcp.f32 %v1353_v60  ;;  %v998_v45 = vsub.f32 %v878_v37, %v934_v59  ;;  %v1103_v41 = vmul.f32 1.442695, %v987_v49  ;;  %v1107_v14 = vmul.f32 1.442695, %v989_v50 }
 0x1ea   :  { %2264 = vpow2.f32 %v1097_v54  ;;  %v3617_v58 = vmul.f32 1.442695, %v990_v18  ;;  %v3619_v38 = vmul.f32 1.442695, %v991_v27  ;;  %v3621_v31 = vmul.f32 1.442695, %v992_v4 }
 0x1eb   :  { %v2261_v9 = vpop.eup %2260  ;;  %2266 = vpow2.f32 %v1095_v26  ;;  %v3648_v49 = vmul.f32 1.442695, %v997_v35  ;;  %v3650_v33 = vmul.f32 1.442695, %v998_v45 }
 0x1ec   :  { %v1393_v2 = vrot.slane %v2261_v9, %v2875_v51  ;;  %2268 = vpow2.f32 %v1099_v29 }
 0x1ed   :  { %2270 = vpow2.f32 %v1101_v1 }
 0x1ee   :  { %v1438_v8 = vmul.f32 %v3480_v24, %v1393_v2  ;;  %v1439_v63 = vmul.f32 %v3490_v21, %v1393_v2  ;;  %v1440_v12 = vmul.f32 %v3503_v62, %v1393_v2  ;;  %v1441_v56 = vmul.f32 %v3508_v19, %v1393_v2 }
 0x1ef   :  { %v1442_v37 = vmul.f32 %v3516_v10, %v1393_v2  ;;  %v1443_v44 = vmul.f32 %v3521_v46, %v1393_v2  ;;  %v1444_v23 = vmul.f32 %v3526_v30, %v1393_v2  ;;  %v3631_v25 = vmul.f32 %v3534_v39, %v1393_v2 }
 0x1f0   :  { %v1601_v57 = vrot.slane %v1438_v8, %v2875_v51  ;;  %v1605_v28 = vrot.slane %v1439_v63, %v2875_v51  ;;  %v3635_v24 = vmul.f32 1.442695, %v993_v16  ;;  %v1609_v21 = vrot.slane %v1440_v12, %v2875_v51 }
 0x1f1   :  { %v3638_v62 = vmul.f32 1.442695, %v994_v53  ;;  %v3640_v19 = vmul.f32 1.442695, %v995_v6  ;;  %2272 = vpow2.f32 %v1103_v41  ;;  %v3644_v30 = vmul.f32 1.442695, %v996_v42 }
 0x1f2   :  { %v1758_v10 = vmul.f32 %v1601_v57, %v2777_v34  ;;  %v1759_v46 = vmul.f32 %v1605_v28, %v2791_v5  ;;  %v1613_v40 = vrot.slane %v1441_v56, %v2875_v51  ;;  %v1617_v36 = vrot.slane %v1442_v37, %v2875_v51 }
 0x1f3   :  { %v2263_v39 = vpop.eup %2262  ;;  %v1621_v18 = vrot.slane %v1443_v44, %v2875_v51  ;;  %2274 = vpow2.f32 %v1105_v15  ;;  %v1625_v54 = vrot.slane %v1444_v23, %v2875_v51  ;;  %v1629_v60 = vrot.slane %v3631_v25, %v2875_v51 }
 0x1f4   :  { %v1397_v50 = vrot.slane %v2263_v39, %v2875_v51  ;;  %v1818_v20 = vadd.f32 %v1759_v46, %v1758_v10  ;;  %v3654_v59 = vpop.eup %2264  ;;  %v1760_v27 = vmul.f32 %v1609_v21, %v2771_v52  ;;  %2276 = vpow2.f32 %v1107_v14 }
 0x1f5   :  { %v3664_v42 = vpop.eup %2266  ;;  %2278 = vpow2.f32 %v3617_v58 }
 0x1f6   :  { %v1446_v4 = vmul.f32 %v3540_v32, %v1397_v50  ;;  %v1447_v16 = vmul.f32 %v3546_v0, %v1397_v50  ;;  %v1448_v53 = vmul.f32 %v3553_v3, %v1397_v50  ;;  %v1449_v6 = vmul.f32 %v3558_v22, %v1397_v50  ;;  %v3678_v2 = vpop.eup %2268 }
 0x1f7   :  { %v1450_v35 = vmul.f32 %v3561_v11, %v1397_v50  ;;  %v1451_v45 = vmul.f32 %v3568_v7, %v1397_v50  ;;  %v1452_v26 = vmul.f32 %v3572_v61, %v1397_v50  ;;  %v1453_v9 = vmul.f32 %v3576_v17, %v1397_v50  ;;  %v3684_v14 = vpop.eup %2270 }
 0x1f8   :  { %v1633_v29 = vrot.slane %v1446_v4, %v2875_v51  ;;  %v1637_v32 = vrot.slane %v1447_v16, %v2875_v51  ;;  %v1641_v0 = vrot.slane %v1448_v53, %v2875_v51  ;;  %v1282_v3 = vrot.slane %v3654_v59, 7 }
 0x1f9   :  { %v1645_v22 = vrot.slane %v1449_v6, %v2875_v51  ;;  %v1649_v1 = vrot.slane %v1450_v35, %v2875_v51  ;;  %v1761_v11 = vmul.f32 %v1613_v40, %v2780_v47  ;;  %v1762_v7 = vmul.f32 %v1617_v36, %v2812_v55 }
 0x1fa   :  { %v1763_v61 = vmul.f32 %v1621_v18, %v2866_v48  ;;  %v1764_v17 = vmul.f32 %v1625_v54, %v2809_v13  ;;  %v1766_v41 = vmul.f32 %v1633_v29, %v2777_v34  ;;  %v1767_v15 = vmul.f32 %v1637_v32, %v2791_v5 }
 0x1fb   :  { %v1653_v8 = vrot.slane %v1451_v45, %v2875_v51  ;;  %v1657_v63 = vrot.slane %v1452_v26, %v2875_v51  ;;  %v1661_v12 = vrot.slane %v1453_v9, %v2875_v51  ;;  %v1768_v56 = vmul.f32 %v1641_v0, %v2771_v52  ;;  %v3690_v37 = vpop.eup %2272 }
 0x1fc   :  { %v1819_v44 = vadd.f32 %v1818_v20, %v1760_v27  ;;  %v1825_v23 = vadd.f32 %v1767_v15, %v1766_v41  ;;  %v1283_v25 = vsel %vm1192_vm1, %v1282_v3, %v3664_v42  ;;  %v1769_v57 = vmul.f32 %v1645_v22, %v2780_v47 }
 0x1fd   :  { %v1770_v28 = vmul.f32 %v1649_v1, %v2812_v55  ;;  %2280 = vpow2.f32 %v3619_v38  ;;  %v1284_v21 = vrot.slane %v3678_v2, 6  ;;  %v3699_v10 = vpop.eup %2274  ;;  %v1286_v40 = vrot.slane %v3684_v14, 5 }
 0x1fe   :  { %v1820_v46 = vadd.f32 %v1819_v44, %v1761_v11  ;;  %v1826_v39 = vadd.f32 %v1825_v23, %v1768_v56  ;;  %2282 = vpow2.f32 %v3621_v31  ;;  %v3703_v58 = vpop.eup %2276  ;;  %v1288_v50 = vrot.slane %v3690_v37, 4 }
 0x1ff   :  { %2284 = vpow2.f32 %v3635_v24  ;;  %v1285_v36 = vsel %vm1195_vm2, %v1284_v21, %v1283_v25  ;;  %v1290_v38 = vrot.slane %v3699_v10, 3  ;;  %v1771_v31 = vmul.f32 %v1653_v8, %v2866_v48  ;;  %v2279_v26 = vpop.eup %2278 }
 0x200   :  { %v1821_v18 = vadd.f32 %v1820_v46, %v1762_v7  ;;  %v1827_v20 = vadd.f32 %v1826_v39, %v1769_v57  ;;  %2286 = vpow2.f32 %v3638_v62  ;;  %v1287_v54 = vsel %vm1198_vm3, %v1286_v40, %v1285_v36 }
 0x201   :  { %2288 = vpow2.f32 %v3640_v19  ;;  %v1289_v27 = vsel %vm1201_vm4, %v1288_v50, %v1287_v54  ;;  %v1292_v24 = vrot.slane %v3703_v58, 2  ;;  %v1765_v6 = vmul.f32 %v1629_v60, %v3969_v43 }
 0x202   :  { %v1822_v4 = vadd.f32 %v1821_v18, %v1763_v61  ;;  %v1828_v16 = vadd.f32 %v1827_v20, %v1770_v28  ;;  %2290 = vpow2.f32 %v3644_v30  ;;  %v1291_v53 = vsel %vm1204_vm5, %v1290_v38, %v1289_v27 }
 0x203   :  { %2292 = vpow2.f32 %v3648_v49  ;;  %v1293_v62 = vsel %vm1207_vm6, %v1292_v24, %v1291_v53  ;;  %v1772_v35 = vmul.f32 %v1657_v63, %v2809_v13  ;;  %v1773_v9 = vmul.f32 %v1661_v12, %v3969_v43 }
 0x204   :  { %v1823_v45 = vadd.f32 %v1822_v4, %v1764_v17  ;;  %v1829_v19 = vadd.f32 %v1828_v16, %v1771_v31  ;;  %2294 = vpow2.f32 %v3650_v33  ;;  %v1294_v0 = vrot.slane %v2279_v26, 1 }
 0x206   :  { %v1824_v29 = vadd.f32 %v1823_v45, %v1765_v6  ;;  %v1830_v32 = vadd.f32 %v1829_v19, %v1772_v35  ;;  %v1295_v49 = vsel %vm1210_vm7, %v1294_v0, %v1293_v62 }
 0x207   :  { %v2281_v30 = vpop.eup %2280  ;;  %v1354_v17 = vrot.slane %v1295_v49, 4 }
 0x208   :  { %v2283_v3 = vpop.eup %2282  ;;  %v1831_v22 = vadd.f32 %v1830_v32, %v1773_v9 }
 0x209   :  { %v2285_v60 = vpop.eup %2284  ;;  %v1296_v1 = vrot.slane %v2283_v3, 7  ;;  %v1355_v56 = vadd.f32 %v1354_v17, %v1295_v49 }
 0x20a   :  { %v2287_v11 = vpop.eup %2286  ;;  %v1848_v7 = vpack.c.bf16 %v1831_v22, %v1824_v29  ;;  %v1298_v61 = vrot.slane %v2285_v60, 6 }
 0x20b   :  { %v2289_v41 = vpop.eup %2288  ;;  %v1297_v33 = vsel %vm1192_vm1, %v1296_v1, %v2281_v30  ;;  %v1300_v15 = vrot.slane %v2287_v11, 5  ;;  %v1356_v46 = vrot.slane %v1355_v56, 2 }
 0x20c   :  { %v2291_v8 = vpop.eup %2290  ;;  %2129 = vmatprep.mubr.bf16.mxu1 %v1848_v7  ;;  %v1299_v63 = vsel %vm1195_vm2, %v1298_v61, %v1297_v33  ;;  %v1302_v12 = vrot.slane %v2289_v41, 4 }
 0x20d   :  { %v2293_v44 = vpop.eup %2292  ;;  %v1301_v23 = vsel %vm1198_vm3, %v1300_v15, %v1299_v63  ;;  %v1304_v25 = vrot.slane %v2291_v8, 3  ;;  %v1357_v50 = vadd.f32 %v1356_v46, %v1355_v56 }
 0x20e   :  { %v2295_v57 = vpop.eup %2294  ;;  %v1303_v28 = vsel %vm1201_vm4, %v1302_v12, %v1301_v23  ;;  %v1306_v21 = vrot.slane %v2293_v44, 2 }
 0x20f   :  { %v1305_v39 = vsel %vm1204_vm5, %v1304_v25, %v1303_v28  ;;  %v1308_v40 = vrot.slane %v2295_v57, 1  ;;  %v1358_v18 = vrot.slane %v1357_v50, 1 }
 0x210   :  { %v1307_v36 = vsel %vm1207_vm6, %v1306_v21, %v1305_v39 }
 0x211   :  { %v1309_v38 = vsel %vm1210_vm7, %v1308_v40, %v1307_v36  ;;  %v1359_v54 = vadd.f32 %v1358_v18, %v1357_v50 }
 0x212   :  { %v1360_v20 = vrot.slane %v1309_v38, 4 }
 0x213   :  { %2296 = vrcp.f32 %v1359_v54 }
 0x214   :  { %v1361_v31 = vadd.f32 %v1360_v20, %v1309_v38 }
 0x216   :  { %v1362_v27 = vrot.slane %v1361_v31, 2 }
 0x218   :  { %v1363_v24 = vadd.f32 %v1362_v27, %v1361_v31 }
 0x21a   :  { %v1364_v4 = vrot.slane %v1363_v24, 1 }
 0x21c   :  { %v1365_v16 = vadd.f32 %v1364_v4, %v1363_v24 }
 0x21d   :  { %v2297_v53 = vpop.eup %2296 }
 0x21e   :  { %2298 = vrcp.f32 %v1365_v16  ;;  %v1401_v6 = vrot.slane %v2297_v53, %v2875_v51 }
 0x220   :  { %v1454_v62 = vmul.f32 %v3664_v42, %v1401_v6  ;;  %v1455_v35 = vmul.f32 %v3654_v59, %v1401_v6  ;;  %v1456_v45 = vmul.f32 %v3678_v2, %v1401_v6  ;;  %v1457_v19 = vmul.f32 %v3684_v14, %v1401_v6 }
 0x221   :  { %v1458_v9 = vmul.f32 %v3690_v37, %v1401_v6  ;;  %v1459_v29 = vmul.f32 %v3699_v10, %v1401_v6  ;;  %v1460_v32 = vmul.f32 %v3703_v58, %v1401_v6  ;;  %v1461_v0 = vmul.f32 %v2279_v26, %v1401_v6 }
 0x222   :  { %v1665_v22 = vrot.slane %v1454_v62, %v2875_v51  ;;  %v1669_v49 = vrot.slane %v1455_v35, %v2875_v51  ;;  %v1673_v14 = vrot.slane %v1456_v45, %v2875_v51  ;;  %v1677_v37 = vrot.slane %v1457_v19, %v2875_v51 }
 0x223   :  { %v1681_v25 = vrot.slane %v1458_v9, %v2875_v51  ;;  %v1689_v46 = vrot.slane %v1460_v32, %v2875_v51  ;;  %v1693_v50 = vrot.slane %v1461_v0, %v2875_v51 }
 0x224   :  { %v1774_v1 = vmul.f32 %v1665_v22, %v2777_v34  ;;  %v1775_v42 = vmul.f32 %v1669_v49, %v2791_v5  ;;  %v1776_v21 = vmul.f32 %v1673_v14, %v2771_v52 }
 0x225   :  { %v1778_v39 = vmul.f32 %v1681_v25, %v2812_v55  ;;  %v1780_v31 = vmul.f32 %v1689_v46, %v2809_v13  ;;  %v1781_v16 = vmul.f32 %v1693_v50, %v3969_v43  ;;  %v2306_v46 = vld [vmem:[%s3826_s0 + $0x38] sm:$0xff] }
 0x226   :  { %v1832_v7 = vadd.f32 %v1775_v42, %v1774_v1 }
 0x228   :  { %v2299_v59 = vpop.eup %2298 }
 0x229   :  { %v1405_v2 = vrot.slane %v2299_v59, %v2875_v51 }
 0x22b   :  { %v1462_v10 = vmul.f32 %v2281_v30, %v1405_v2  ;;  %v1463_v61 = vmul.f32 %v2283_v3, %v1405_v2  ;;  %v1464_v58 = vmul.f32 %v2285_v60, %v1405_v2  ;;  %v1465_v26 = vmul.f32 %v2287_v11, %v1405_v2 }
 0x22c   :  { %v1466_v17 = vmul.f32 %v2289_v41, %v1405_v2  ;;  %v1467_v33 = vmul.f32 %v2291_v8, %v1405_v2  ;;  %v1468_v15 = vmul.f32 %v2293_v44, %v1405_v2  ;;  %v1469_v63 = vmul.f32 %v2295_v57, %v1405_v2  ;;  %v2300_v2 = vld [vmem:[%s3826_s0 + $0x10] sm:$0xff] }
 0x22d   :  { %v1697_v12 = vrot.slane %v1462_v10, %v2875_v51  ;;  %v1701_v56 = vrot.slane %v1463_v61, %v2875_v51  ;;  %v1705_v23 = vrot.slane %v1464_v58, %v2875_v51  ;;  %v1709_v28 = vrot.slane %v1465_v26, %v2875_v51  ;;  %v2302_v58 = vld [vmem:[%s3826_s0 + $0x18] sm:$0xff] }
 0x22e   :  { %v1685_v60 = vrot.slane %v1459_v29, %v2875_v51  ;;  %v1777_v11 = vmul.f32 %v1677_v37, %v2780_v47  ;;  %v1713_v41 = vrot.slane %v1466_v17, %v2875_v51  ;;  %v1833_v44 = vadd.f32 %v1832_v7, %v1776_v21  ;;  %v2301_v37 = vld [vmem:[%s3826_s0] sm:$0xff]  ;;  %v2303_v17 = vld [vmem:[%s3826_s0 + $0x8] sm:$0xff] }
 0x22f   :  { %v1782_v30 = vmul.f32 %v1697_v12, %v2777_v34  ;;  %v1783_v3 = vmul.f32 %v1701_v56, %v2791_v5  ;;  %v1784_v8 = vmul.f32 %v1705_v23, %v2771_v52  ;;  %v1717_v40 = vrot.slane %v1467_v33, %v2875_v51 }
 0x230   :  { %v1785_v34 = vmul.f32 %v1709_v28, %v2780_v47  ;;  %v1834_v36 = vadd.f32 %v1833_v44, %v1777_v11  ;;  %v1779_v38 = vmul.f32 %v1685_v60, %v2866_v48  ;;  %v1721_v18 = vrot.slane %v1468_v15, %v2875_v51  ;;  %v2304_v60 = vld [vmem:[%s3826_s0 + $0x30] sm:$0xff] }
 0x231   :  { %v1839_v57 = vadd.f32 %v1783_v3, %v1782_v30  ;;  %v1786_v52 = vmul.f32 %v1713_v41, %v2812_v55  ;;  %v1725_v27 = vrot.slane %v1469_v63, %v2875_v51  ;;  %v1787_v24 = vmul.f32 %v1717_v40, %v2866_v48  ;;  %v2040_v51 = vld [vmem:[%s3830_s4] ss:$0 sm:$0xff]  ;;  %v2307_v40 = vld [vmem:[%s3826_s0 + $0x28] sm:$0xff] }
 0x232   :  { %v1835_v20 = vadd.f32 %v1834_v36, %v1778_v39  ;;  %v1788_v53 = vmul.f32 %v1721_v18, %v2809_v13  ;;  %v1987_v29 = vstv %s3831_s5 }
 0x233   :  { %v1840_v5 = vadd.f32 %v1839_v57, %v1784_v8  ;;  %v1789_v35 = vmul.f32 %v1725_v27, %v3969_v43  ;;  %v2305_v8 = vld [vmem:[%s3826_s0 + $0x20] sm:$0xff] }
 0x234   :  { %v1836_v4 = vadd.f32 %v1835_v20, %v1779_v38 }
 0x235   :  { %v1841_v54 = vadd.f32 %v1840_v5, %v1785_v34 }
 0x236   :  { %v1837_v6 = vadd.f32 %v1836_v4, %v1780_v31 }
 0x237   :  { %v1842_v47 = vadd.f32 %v1841_v54, %v1786_v52 }
 0x238   :  { %v1838_v45 = vadd.f32 %v1837_v6, %v1781_v16 }
 0x239   :  { %v1843_v62 = vadd.f32 %v1842_v47, %v1787_v24 }
 0x23b   :  { %v1844_v55 = vadd.f32 %v1843_v62, %v1788_v53 }
 0x23d   :  { %v1845_v19 = vadd.f32 %v1844_v55, %v1789_v35 }
 0x23f   :  { %v1849_v9 = vpack.c.bf16 %v1845_v19, %v1838_v45 }
 0x241   :  { %2130 = vmatmul.mubr.bf16.gmra.mrb[4].mxu1 %v1849_v9 }
 0x2a2   :  { %v2127_v48 = vpop.f32.mrb[0].mxu1 }
 0x2a3   :  { %v1964_v32 = vadd.f32 %v2127_v48, %v2040_v51  ;;  %v1955_v13 = vpop.f32.mrb[1].mxu1 }
 0x2a4   :  { %v1956_v0 = vadd.f32 %v2040_v51, %v1955_v13  ;;  %v2128_v22 = vpop.f32.mrb[2].mxu1 }
 0x2a5   :  { %v1990_v49 = vmul.f32 %v1987_v29, %v1964_v32  ;;  %v1967_v43 = vadd.f32 %v2128_v22, %v2040_v51  ;;  %v1958_v1 = vpop.f32.mrb[3].mxu1 }
 0x2a6   :  { %v1988_v42 = vmul.f32 %v1987_v29, %v1956_v0  ;;  %v1959_v59 = vadd.f32 %v2040_v51, %v1958_v1 }
 0x2a7   :  { %v1998_v7 = vadd.f32 %v2300_v2, %v1990_v49  ;;  %v1991_v14 = vmul.f32 %v1987_v29, %v1967_v43 }
 0x2a8   :  { %v1996_v10 = vadd.f32 %v2301_v37, %v1988_v42  ;;  %v1989_v61 = vmul.f32 %v1987_v29, %v1959_v59 }
 0x2a9   :  { %2006 = vst [vmem:[%s3832_s6 + $0x10] sm:$0xff] %v1998_v7  ;;  %v1999_v26 = vadd.f32 %v2302_v58, %v1991_v14 }
 0x2aa   :  { %2004 = vst [vmem:[%s3832_s6] sm:$0xff] %v1996_v10  ;;  %v1997_v33 = vadd.f32 %v2303_v17, %v1989_v61 }
 0x2ab   :  { %2007 = vst [vmem:[%s3832_s6 + $0x18] sm:$0xff] %v1999_v26 }
 0x2ac   :  { %2005 = vst [vmem:[%s3832_s6 + $0x8] sm:$0xff] %v1997_v33 }
 0x314   :  { %v2131_v15 = vpop.f32.mrb[4].mxu1 }
 0x315   :  { %v1980_v63 = vadd.f32 %v2131_v15, %v2040_v51  ;;  %v1971_v12 = vpop.f32.mrb[5].mxu1 }
 0x316   :  { %v1972_v56 = vadd.f32 %v2040_v51, %v1971_v12  ;;  %v2132_v23 = vpop.f32.mrb[6].mxu1 }
 0x317   :  { %v1994_v25 = vmul.f32 %v1987_v29, %v1980_v63  ;;  %v1983_v28 = vadd.f32 %v2132_v23, %v2040_v51  ;;  %v1974_v21 = vpop.f32.mrb[7].mxu1 }
 0x318   :  { %v1992_v30 = vmul.f32 %v1987_v29, %v1972_v56  ;;  %v1975_v3 = vadd.f32 %v2040_v51, %v1974_v21 }
 0x319   :  { %v2002_v11 = vadd.f32 %v2304_v60, %v1994_v25  ;;  %v1995_v41 = vmul.f32 %v1987_v29, %v1983_v28 }
 0x31a   :  { %v2000_v44 = vadd.f32 %v2305_v8, %v1992_v30  ;;  %v1993_v57 = vmul.f32 %v1987_v29, %v1975_v3 }
 0x31b   :  { %2010 = vst [vmem:[%s3832_s6 + $0x30] sm:$0xff] %v2002_v11  ;;  %v2003_v39 = vadd.f32 %v2306_v46, %v1995_v41 }
 0x31c   :  { %2008 = vst [vmem:[%s3832_s6 + $0x20] sm:$0xff] %v2000_v44  ;;  %v2001_v34 = vadd.f32 %v2307_v40, %v1993_v57 }
 0x31d   :  { %2011 = vst [vmem:[%s3832_s6 + $0x38] sm:$0xff] %v2003_v39 }
 0x31e   :  { %2009 = vst [vmem:[%s3832_s6 + $0x28] sm:$0xff] %v2001_v34 }

</bundles_post_ra>
